<compile_context>
chip_gen: v7x
topology: tpu7x:2x2x1
jax: 0.10.0
libtpu: 0.0.40
codegen_flags: <defaults>
</compile_context>

<pallas_src>
import jax
import jax.numpy as jnp
from jax import lax
from jax.experimental import pallas as pl
from jax.experimental.pallas import tpu as pltpu


# ------------------------------ Pallas kernel ------------------------------ #

def _nonlocal_kernel(x_ref, w_qk_ref, w_mg_ref, o_ref):
    """Fused NonLocalBlock forward for one batch element (channel-first layout).

    x_ref:    (1, C, HW)  bf16   (spatial flattened; HW on the lane axis)
    w_qk_ref: (2*Ci, C)   bf16   rows [0:Ci]=w_theta, [Ci:2Ci]=w_phi  (resident)
    w_mg_ref: (C, C)      bf16   composed w_mask @ w_g                (resident)
    o_ref:    (1, C, HW)  bf16
    """
    ci = w_qk_ref.shape[0] // 2
    x = x_ref[0]                                                      # (C, HW) bf16

    # Fused theta/phi 1x1 convs: one full-width MXU pass, f32 accumulation.
    proj = jnp.dot(w_qk_ref[...], x, preferred_element_type=jnp.float32)   # (2Ci, HW)
    theta = proj[:ci]                                                 # (Ci, HW) f32
    phi = proj[ci:]                                                   # (Ci, HW) f32

    # Composed g -> conv_mask path: gm = (w_mask @ w_g) @ x.
    gm = jnp.dot(w_mg_ref[...], x, preferred_element_type=jnp.float32)     # (C, HW)

    # logits[i, j] = sum_d theta[d, i] * phi[d, j]   (theta^T @ phi).
    # Explicit (Ci, HW)->(HW, Ci) transpose: O(HW*Ci), tiny next to the HW^2 dots.
    logits = jnp.dot(jnp.transpose(theta).astype(jnp.bfloat16),
                     phi.astype(jnp.bfloat16),
                     preferred_element_type=jnp.float32)              # (HW_i, HW_j)

    # torch Softmax(dim=1): normalize over i -> per-COLUMN (over-i) statistics.
    # Keep e unnormalized; fold 1/sum into the (C, HW) value slab instead of
    # touching the (HW, HW) matrix again.
    m = jnp.max(logits, axis=0, keepdims=True)                        # (1, HW_j)
    e = jnp.exp(logits - m)                                           # f32 (v5e-safe)
    s = jnp.sum(e, axis=0, keepdims=True)                             # (1, HW_j) f32
    r = pl.reciprocal(s, approx=True)                                 # EUP (free slot)

    gm_scaled = (gm * r).astype(jnp.bfloat16)                         # (C, HW_j)

    # mask[c, i] = sum_j gm_scaled[c, j] * e[i, j]   (contract last dims, q@k^T form).
    mask = lax.dot_general(gm_scaled, e.astype(jnp.bfloat16),
                           dimension_numbers=(((1,), (1,)), ((), ())),
                           preferred_element_type=jnp.float32)        # (C, HW_i)

    # Residual add in f32, store bf16 (lane-dense HW last dim -> unmasked vst).
    o_ref[0] = (mask + x.astype(jnp.float32)).astype(jnp.bfloat16)


# ------------------------------ Python wrapper ------------------------------ #

def nonlocal_block_forward(x_nchw, params):
    """NonLocalBlock forward (PyTorch NCHW semantics), one fused Pallas call.

    No layout transposes anywhere: the kernel works directly on the NCHW tensor
    with spatial flattened (free reshape), H*W on the lane axis.
    """
    N, C, H, W = x_nchw.shape
    Ci = C // 2
    HW = H * W

    x = x_nchw.reshape(N, C, HW).astype(jnp.bfloat16)

    # 1x1 conv weights (O, I, 1, 1) -> (O, I), kept in PyTorch orientation.
    w_theta = params["w_theta"][:, :, 0, 0]             # (Ci, C) f32
    w_phi = params["w_phi"][:, :, 0, 0]                 # (Ci, C) f32
    w_g = params["w_g"][:, :, 0, 0]                     # (Ci, C) f32
    w_mask = params["w_mask"][:, :, 0, 0]               # (C, Ci) f32

    # Fused Q/K weight; composed value/mask weight (compose in f32, cast once).
    w_qk = jnp.concatenate([w_theta, w_phi], axis=0).astype(jnp.bfloat16)  # (2Ci, C)
    w_mg = jnp.dot(w_mask, w_g).astype(jnp.bfloat16)                       # (C, C)

    out = pl.pallas_call(
        _nonlocal_kernel,
        out_shape=jax.ShapeDtypeStruct((N, C, HW), jnp.bfloat16),
        grid_spec=pltpu.PrefetchScalarGridSpec(
            num_scalar_prefetch=0,
            grid=(N,),
            in_specs=[
                pl.BlockSpec((1, C, HW), lambda b: (b, 0, 0)),   # per-batch activations
                pl.BlockSpec((2 * Ci, C), lambda b: (0, 0)),     # resident fused Q/K weight
                pl.BlockSpec((C, C), lambda b: (0, 0)),          # resident composed weight
            ],
            out_specs=pl.BlockSpec((1, C, HW), lambda b: (b, 0, 0)),
        ),
        compiler_params=pltpu.CompilerParams(
            dimension_semantics=("parallel",),
            # ~2 MiB actually used at this shape; raise (v5e/v6e) or tile HW
            # with a two-pass column softmax (v7x, 64 MiB VMEM) when scaling.
            vmem_limit_bytes=32 * 1024 * 1024,
        ),
    )(x, w_qk, w_mg)

    return out.reshape(N, C, H, W)


# --------------------------- Reference (pure JAX) --------------------------- #

def ref_nonlocal_block(x, params):
    b, c, h, w = x.shape
    ci = c // 2
    dn = ("NCHW", "OIHW", "NCHW")

    def conv1x1(inp, wt):
        return lax.conv_general_dilated(inp, wt, (1, 1), "VALID",
                                        dimension_numbers=dn)

    x_phi = conv1x1(x, params["w_phi"]).reshape(b, ci, h * w)                         # (b, ci, hw)
    x_theta = conv1x1(x, params["w_theta"]).reshape(b, ci, h * w).transpose(0, 2, 1)  # (b, hw, ci)
    x_g = conv1x1(x, params["w_g"]).reshape(b, ci, h * w).transpose(0, 2, 1)          # (b, hw, ci)

    attn = jnp.matmul(x_theta, x_phi)                 # (b, hw, hw)
    attn = jax.nn.softmax(attn, axis=1)               # torch Softmax(dim=1)
    y = jnp.matmul(attn, x_g)                         # (b, hw, ci)
    y = y.transpose(0, 2, 1).reshape(b, ci, h, w)
    mask = conv1x1(y, params["w_mask"])
    return mask + x


# ----------------------------------- Main ----------------------------------- #

if __name__ == "__main__":
    key = jax.random.PRNGKey(0)
    kx, k1, k2, k3, k4 = jax.random.split(key, 5)

    # Lane-dense demo shapes: C = 128 channels (Ci = 64), 16x16 spatial -> HW = 256.
    N, C, H, W = 2, 128, 16, 16
    Ci = C // 2

    x = jax.random.normal(kx, (N, C, H, W), jnp.float32)
    params = dict(
        w_phi=0.05 * jax.random.normal(k1, (Ci, C, 1, 1), jnp.float32),
        w_theta=0.05 * jax.random.normal(k2, (Ci, C, 1, 1), jnp.float32),
        w_g=0.05 * jax.random.normal(k3, (Ci, C, 1, 1), jnp.float32),
        w_mask=0.05 * jax.random.normal(k4, (C, Ci, 1, 1), jnp.float32),
    )

    fwd = jax.jit(nonlocal_block_forward)
    ref_fwd = jax.jit(ref_nonlocal_block)

    out = jax.block_until_ready(fwd(x, params))
    ref = jax.block_until_ready(ref_fwd(x, params))

    assert out.shape == ref.shape, (out.shape, ref.shape)
    # bf16 MXU operands / bf16 output with f32 accumulation -> relaxed tolerance
    # versus the f32 reference.
    out_f32 = out.astype(jnp.float32)
    if not jnp.allclose(out_f32, ref, rtol=3e-2, atol=3e-2):
        raise AssertionError(
            f"mismatch: max abs err {float(jnp.max(jnp.abs(out_f32 - ref)))}")

    print("KERNEL_OK")
</pallas_src>

<mosaic_0001>
module attributes {stable_mosaic.version = 11 : i64} {
  func.func @_nonlocal_kernel(%arg0: i32, %arg1: memref<1x128x256xbf16, #tpu.memory_space<vmem>>, %arg2: memref<128x128xbf16, #tpu.memory_space<vmem>>, %arg3: memref<128x128xbf16, #tpu.memory_space<vmem>>, %arg4: memref<1x128x256xbf16, #tpu.memory_space<vmem>>) attributes {dimension_semantics = [#tpu.dimension_semantics<parallel>], iteration_bounds = array<i64: 2>, scalar_prefetch = 0 : i64, scratch_operands = 0 : i64, tpu.core_type = #tpu.core_type<tc>, window_params = [{transform_indices = @transform_0, window_bounds = array<i64: 1, 128, 256>}, {pipeline_mode = #tpu.pipeline_mode<synchronous>, transform_indices = @transform_1, window_bounds = array<i64: 128, 128>}, {pipeline_mode = #tpu.pipeline_mode<synchronous>, transform_indices = @transform_2, window_bounds = array<i64: 128, 128>}, {transform_indices = @transform_3, window_bounds = array<i64: 1, 128, 256>}]} {
    %c0 = arith.constant 0 : index
    %c0_0 = arith.constant 0 : index
    %c0_1 = arith.constant 0 : index
    %0 = vector.load %arg1[%c0, %c0_0, %c0_1] : memref<1x128x256xbf16, #tpu.memory_space<vmem>>, vector<1x128x256xbf16>
    %1 = vector.shape_cast %0 : vector<1x128x256xbf16> to vector<128x256xbf16>
    %c0_2 = arith.constant 0 : index
    %c0_3 = arith.constant 0 : index
    %2 = vector.load %arg2[%c0_2, %c0_3] : memref<128x128xbf16, #tpu.memory_space<vmem>>, vector<128x128xbf16>
    %cst = arith.constant dense<0.000000e+00> : vector<128x256xf32>
    %3 = tpu.matmul %2, %1, %cst {dimension_numbers = #tpu.dot_dimension_numbers<[1], [0], [0], [1], [0, 0, 1, 1], [], []>} : vector<128x128xbf16>, vector<128x256xbf16>, vector<128x256xf32> -> vector<128x256xf32>
    %4 = vector.extract_strided_slice %3 {offsets = [0, 0], sizes = [64, 256], strides = [1, 1]} : vector<128x256xf32> to vector<64x256xf32>
    %5 = vector.extract_strided_slice %3 {offsets = [64, 0], sizes = [64, 256], strides = [1, 1]} : vector<128x256xf32> to vector<64x256xf32>
    %c0_4 = arith.constant 0 : index
    %c0_5 = arith.constant 0 : index
    %6 = vector.load %arg3[%c0_4, %c0_5] : memref<128x128xbf16, #tpu.memory_space<vmem>>, vector<128x128xbf16>
    %cst_6 = arith.constant dense<0.000000e+00> : vector<128x256xf32>
    %7 = tpu.matmul %6, %1, %cst_6 {dimension_numbers = #tpu.dot_dimension_numbers<[1], [0], [0], [1], [0, 0, 1, 1], [], []>} : vector<128x128xbf16>, vector<128x256xbf16>, vector<128x256xf32> -> vector<128x256xf32>
    %8 = tpu.transpose %4, [1, 0] : vector<64x256xf32> -> vector<256x64xf32>
    %9 = arith.truncf %8 : vector<256x64xf32> to vector<256x64xbf16>
    %10 = arith.truncf %5 : vector<64x256xf32> to vector<64x256xbf16>
    %cst_7 = arith.constant dense<0.000000e+00> : vector<256x256xf32>
    %11 = tpu.matmul %9, %10, %cst_7 {dimension_numbers = #tpu.dot_dimension_numbers<[1], [0], [0], [1], [0, 0, 1, 1], [], []>} : vector<256x64xbf16>, vector<64x256xbf16>, vector<256x256xf32> -> vector<256x256xf32>
    %cst_8 = arith.constant dense<0xFF800000> : vector<256xf32>
    %12 = vector.multi_reduction <maximumf>, %11, %cst_8 [0] : vector<256x256xf32> to vector<256xf32>
    %13 = vector.shape_cast %12 : vector<256xf32> to vector<1x256xf32>
    %14 = vector.broadcast %13 : vector<1x256xf32> to vector<256x256xf32>
    %15 = arith.subf %11, %14 : vector<256x256xf32>
    %16 = math.exp %15 : vector<256x256xf32>
    %cst_9 = arith.constant dense<0.000000e+00> : vector<256xf32>
    %17 = vector.multi_reduction <add>, %16, %cst_9 [0] : vector<256x256xf32> to vector<256xf32>
    %18 = vector.shape_cast %17 : vector<256xf32> to vector<1x256xf32>
    %19 = tpu.reciprocal %18 {approx = true} : vector<1x256xf32> -> vector<1x256xf32>
    %20 = vector.broadcast %19 : vector<1x256xf32> to vector<128x256xf32>
    %21 = arith.mulf %7, %20 : vector<128x256xf32>
    %22 = arith.truncf %21 : vector<128x256xf32> to vector<128x256xbf16>
    %23 = arith.truncf %16 : vector<256x256xf32> to vector<256x256xbf16>
    %cst_10 = arith.constant dense<0.000000e+00> : vector<128x256xf32>
    %24 = tpu.matmul %22, %23, %cst_10 {dimension_numbers = #tpu.dot_dimension_numbers<[1], [1], [0], [0], [0, 0, 1, 0], [], []>} : vector<128x256xbf16>, vector<256x256xbf16>, vector<128x256xf32> -> vector<128x256xf32>
    %25 = arith.extf %1 : vector<128x256xbf16> to vector<128x256xf32>
    %26 = arith.addf %24, %25 : vector<128x256xf32>
    %27 = arith.truncf %26 : vector<128x256xf32> to vector<128x256xbf16>
    %c0_11 = arith.constant 0 : index
    %c0_12 = arith.constant 0 : index
    %c0_13 = arith.constant 0 : index
    %28 = vector.load %arg4[%c0_11, %c0_12, %c0_13] : memref<1x128x256xbf16, #tpu.memory_space<vmem>>, vector<1x128x256xbf16>
    %29 = vector.shape_cast %28 : vector<1x128x256xbf16> to vector<128x256xbf16>
    %30 = vector.shape_cast %27 : vector<128x256xbf16> to vector<1x128x256xbf16>
    tpu.vector_store %arg4[%c0_11, %c0_12, %c0_13], %30 {strides = array<i32>} : memref<1x128x256xbf16, #tpu.memory_space<vmem>>, vector<1x128x256xbf16>,
    return
  }
  func.func @transform_0(%arg0: i32) -> (i32, i32, i32) {
    %c0_i32 = arith.constant 0 : i32
    %c0_i32_0 = arith.constant 0 : i32
    %c0_i32_1 = arith.constant 0 : i32
    return %arg0, %c0_i32, %c0_i32_0 : i32, i32, i32
  }
  func.func @transform_1(%arg0: i32) -> (i32, i32) {
    %c0_i32 = arith.constant 0 : i32
    %c0_i32_0 = arith.constant 0 : i32
    %c0_i32_1 = arith.constant 0 : i32
    return %c0_i32, %c0_i32_0 : i32, i32
  }
  func.func @transform_2(%arg0: i32) -> (i32, i32) {
    %c0_i32 = arith.constant 0 : i32
    %c0_i32_0 = arith.constant 0 : i32
    %c0_i32_1 = arith.constant 0 : i32
    return %c0_i32, %c0_i32_0 : i32, i32
  }
  func.func @transform_3(%arg0: i32) -> (i32, i32, i32) {
    %c0_i32 = arith.constant 0 : i32
    %c0_i32_0 = arith.constant 0 : i32
    %c0_i32_1 = arith.constant 0 : i32
    return %arg0, %c0_i32, %c0_i32_0 : i32, i32, i32
  }
}

</mosaic_0001>

<bundles_post_ra>
// kernel: nonlocal_block_forward.1
= control target key start
LH: loop header
LB: loop body
LE: loop exit
PB: predicated region body
PF: predicated region fallthrough
CT: control target
= control target key end

     0   :  { %s1998_s12 = smov 0   ;;  %s3110_s0 = inlined_call_operand.vmem [shape: bf16[2,128,256], index: 0, kind: input, shape index: {}]   ;;  %s3111_s1 = inlined_call_operand.vmem [shape: bf16[128,128], index: 1, kind: input, shape index: {}]   ;;  %s3112_s2 = inlined_call_operand.vmem [shape: bf16[128,128], index: 2, kind: input, shape index: {}]   ;;  %s3113_s3 = inlined_call_operand.vmem [shape: bf16[2,128,256], index: 3, kind: output, shape index: {}]  }
   0x1 LB: > { %s1686_s13 = sadd.s32 4294967295, %s1975_s12   ;;  %p1690_p0 = scmp.ge.s32.totalorder %s1975_s12, 1  ;;  %s1975_s12 = sphi %s1998_s12, %s13_s12  }
   0x2   : > { %p137_p1 = scmp.lt.s32.totalorder %s1975_s12, 3 }
   0x4   : > { %p138_p2 = pnand %p1690_p0, %p137_p1 }
   0x6   : > { %141 = sbr.rel (%p138_p2) target bundleno = 1211 (0x4bb), region = 32 }
   0xd   : > { %p161_p3 = scmp.lt.s32.totalorder %s1686_s13, 1  ;;  %v1977_v0 = vmov 0   ;;  %v1805_v33 = vld [vmem:[%s3111_s1] sm:$0xff]   ;;  %v1806_v34 = vld [vmem:[%s3111_s1 + $0x8] sm:$0xff]   ;;  %v1807_v35 = vld [vmem:[%s3111_s1 + $0x10] sm:$0xff]   ;;  %vm710_vm0 = vcmask 523264  }
   0xe   : > { %364 = vmatprep.mubr.bf16.mxu0 %v1977_v0  ;;  %541 = vmatprep.mubr.bf16.mxu1 %v1977_v0  ;;  %v1808_v36 = vld [vmem:[%s3111_s1 + $0x18] sm:$0xff]   ;;  %v1809_v37 = vld [vmem:[%s3111_s1 + $0x20] sm:$0xff]   ;;  %v1810_v38 = vld [vmem:[%s3111_s1 + $0x28] sm:$0xff]  }
   0xf   : > { %s3333_s13 = smov (!%p161_p3, %s1686_s13), 1  ;;  %v1811_v39 = vld [vmem:[%s3111_s1 + $0x30] sm:$0xff]   ;;  %v1812_v40 = vld [vmem:[%s3111_s1 + $0x38] sm:$0xff]  }
  0x10   : > { %s1761_s14 = sshll.u32 %s3333_s13, 7 }
  0x11   : > { %s2016_s17 = scalar_lea.vmem %s3110_s0, %s1761_s14  ;;  %s3075_s29 = scalar_lea.vmem %s3113_s3, %s1761_s14 }
  0x12   : > { %v172_v1 = vld [vmem:[%s2016_s17] sm:$0xff]  ;;  %v173_v2 = vld [vmem:[%s2016_s17 + $0x8] sm:$0xff]  ;;  %v174_v3 = vld [vmem:[%s2016_s17 + $0x10] sm:$0xff] }
  0x13   : > { %v1704_v4 = vcombine.high %v172_v1, %v173_v2  ;;  %v1703_v5 = vcombine.low %v172_v1, %v173_v2  ;;  %v175_v6 = vld [vmem:[%s2016_s17 + $0x18] sm:$0xff]  ;;  %v176_v8 = vld [vmem:[%s2016_s17 + $0x20] sm:$0xff]  ;;  %v177_v9 = vld [vmem:[%s2016_s17 + $0x28] sm:$0xff] }
  0x14   : > { %v1706_v7 = vcombine.high %v174_v3, %v175_v6  ;;  %v1705_v10 = vcombine.low %v174_v3, %v175_v6  ;;  %v1708_v11 = vcombine.high %v176_v8, %v177_v9  ;;  %v178_v12 = vld [vmem:[%s2016_s17 + $0x30] sm:$0xff]  ;;  %v179_v13 = vld [vmem:[%s2016_s17 + $0x38] sm:$0xff]  ;;  %v1707_v14 = vcombine.low %v176_v8, %v177_v9  ;;  %v180_v15 = vld [vmem:[%s2016_s17 + $0x40] sm:$0xff] }
  0x15   : > { %332 = vmatprep.subr.bf16.mxu0 %v1704_v4  ;;  %509 = vmatprep.subr.bf16.mxu1 %v1704_v4  ;;  %v181_v16 = vld [vmem:[%s2016_s17 + $0x48] sm:$0xff]  ;;  %v1710_v17 = vcombine.high %v178_v12, %v179_v13  ;;  %v1709_v18 = vcombine.low %v178_v12, %v179_v13  ;;  %v182_v20 = vld [vmem:[%s2016_s17 + $0x50] sm:$0xff]  ;;  %v183_v21 = vld [vmem:[%s2016_s17 + $0x58] sm:$0xff] }
  0x16   : > { %333 = vmatpush1.bf16.msra.mxu0 %v1703_v5  ;;  %510 = vmatpush1.bf16.msra.mxu1 %v1703_v5  ;;  %v1712_v19 = vcombine.high %v180_v15, %v181_v16  ;;  %v1711_v22 = vcombine.low %v180_v15, %v181_v16  ;;  %v1714_v23 = vcombine.high %v182_v20, %v183_v21  ;;  %v184_v24 = vld [vmem:[%s2016_s17 + $0x60] sm:$0xff]  ;;  %v185_v25 = vld [vmem:[%s2016_s17 + $0x68] sm:$0xff]  ;;  %v186_v28 = vld [vmem:[%s2016_s17 + $0x70] sm:$0xff] }
  0x17   : > { %334 = vmatprep.subr.bf16.mxu0 %v1706_v7  ;;  %511 = vmatprep.subr.bf16.mxu1 %v1706_v7  ;;  %v1713_v26 = vcombine.low %v182_v20, %v183_v21  ;;  %v1716_v27 = vcombine.high %v184_v24, %v185_v25  ;;  %v187_v29 = vld [vmem:[%s2016_s17 + $0x78] sm:$0xff]  ;;  %v1715_v30 = vcombine.low %v184_v24, %v185_v25 }
  0x18   : > { %v1718_v31 = vcombine.high %v186_v28, %v187_v29  ;;  %v1717_v32 = vcombine.low %v186_v28, %v187_v29 }
  0x1a   : > { %335 = vmatpush1.bf16.msra.mxu0 %v1705_v10  ;;  %512 = vmatpush1.bf16.msra.mxu1 %v1705_v10 }
  0x1b   : > { %336 = vmatprep.subr.bf16.mxu0 %v1708_v11  ;;  %513 = vmatprep.subr.bf16.mxu1 %v1708_v11 }
  0x1e   : > { %337 = vmatpush1.bf16.msra.mxu0 %v1707_v14  ;;  %514 = vmatpush1.bf16.msra.mxu1 %v1707_v14 }
  0x1f   : > { %338 = vmatprep.subr.bf16.mxu0 %v1710_v17  ;;  %515 = vmatprep.subr.bf16.mxu1 %v1710_v17 }
  0x22   : > { %339 = vmatpush1.bf16.msra.mxu0 %v1709_v18  ;;  %516 = vmatpush1.bf16.msra.mxu1 %v1709_v18  ;;  %v1813_v18 = vld [vmem:[%s3112_s2] sm:$0xff]  }
  0x23   : > { %340 = vmatprep.subr.bf16.mxu0 %v1712_v19  ;;  %517 = vmatprep.subr.bf16.mxu1 %v1712_v19 }
  0x26   : > { %341 = vmatpush1.bf16.msra.mxu0 %v1711_v22  ;;  %518 = vmatpush1.bf16.msra.mxu1 %v1711_v22  ;;  %v1814_v22 = vld [vmem:[%s3112_s2 + $0x8] sm:$0xff]  }
  0x27   : > { %342 = vmatprep.subr.bf16.mxu0 %v1714_v23  ;;  %519 = vmatprep.subr.bf16.mxu1 %v1714_v23 }
  0x2a   : > { %343 = vmatpush1.bf16.msra.mxu0 %v1713_v26  ;;  %520 = vmatpush1.bf16.msra.mxu1 %v1713_v26  ;;  %v1815_v26 = vld [vmem:[%s3112_s2 + $0x10] sm:$0xff]  }
  0x2b   : > { %344 = vmatprep.subr.bf16.mxu0 %v1716_v27  ;;  %521 = vmatprep.subr.bf16.mxu1 %v1716_v27 }
  0x2e   : > { %345 = vmatpush1.bf16.msra.mxu0 %v1715_v30  ;;  %522 = vmatpush1.bf16.msra.mxu1 %v1715_v30  ;;  %v1816_v30 = vld [vmem:[%s3112_s2 + $0x18] sm:$0xff]  }
  0x2f   : > { %346 = vmatprep.subr.bf16.mxu0 %v1718_v31  ;;  %523 = vmatprep.subr.bf16.mxu1 %v1718_v31 }
  0x32   : > { %347 = vmatpush1.bf16.msra.mxu0 %v1717_v32  ;;  %524 = vmatpush1.bf16.msra.mxu1 %v1717_v32 }
  0x35   : > { %365 = vmatmul.mubr.bf16.vlgmr.msra.gmra.mrb[0].mxu0 %v1805_v33  ;;  %542 = vmatmul.mubr.bf16.vlgmr.msra.gmra.mrb[0].mxu1 %v1813_v18 }
  0x36   : > { %374 = vmatprep.mubr.bf16.mxu0 %v1977_v0  ;;  %551 = vmatprep.mubr.bf16.mxu1 %v1977_v0 }
  0x3d   : > { %375 = vmatmul.mubr.bf16.gmra.mrb[4].mxu0 %v1806_v34  ;;  %552 = vmatmul.mubr.bf16.gmra.mrb[4].mxu1 %v1814_v22 }
  0x3e   : > { %384 = vmatprep.mubr.bf16.mxu0 %v1977_v0  ;;  %561 = vmatprep.mubr.bf16.mxu1 %v1977_v0 }
  0x45   : > { %385 = vmatmul.mubr.bf16.gmra.mrb[8].mxu0 %v1807_v35  ;;  %562 = vmatmul.mubr.bf16.gmra.mrb[8].mxu1 %v1815_v26 }
  0x46   : > { %394 = vmatprep.mubr.bf16.mxu0 %v1977_v0  ;;  %571 = vmatprep.mubr.bf16.mxu1 %v1977_v0 }
  0x4d   : > { %395 = vmatmul.mubr.bf16.gmra.mrb[12].mxu0 %v1808_v36  ;;  %572 = vmatmul.mubr.bf16.gmra.mrb[12].mxu1 %v1816_v30 }
  0x4e   : > { %404 = vmatprep.mubr.bf16.mxu0 %v1977_v0  ;;  %581 = vmatprep.mubr.bf16.mxu1 %v1977_v0 }
  0x55   : > { %405 = vmatmul.mubr.bf16.gmra.mrb[16].mxu0 %v1809_v37 }
  0x56   : > { %414 = vmatprep.mubr.bf16.mxu0 %v1977_v0 }
  0x5d   : > { %415 = vmatmul.mubr.bf16.gmra.mrb[20].mxu0 %v1810_v38 }
  0x5e   : > { %424 = vmatprep.mubr.bf16.mxu0 %v1977_v0 }
  0x65   : > { %425 = vmatmul.mubr.bf16.gmra.mrb[24].mxu0 %v1811_v39 }
  0x66   : > { %434 = vmatprep.mubr.bf16.mxu0 %v1977_v0 }
  0x6d   : > { %435 = vmatmul.mubr.bf16.gmra.mrb[28].mxu0 %v1812_v40 }
  0x6e   : > { %791 = vmatprep.mubr.bf16.mxu0 %v1977_v0 }
 0x108   : > { %v366_v41 = vpop.f32.mrb[0].mxu0 }
 0x109   : > { %622 = vxpose.xlu0.b32.start [1/8] (short) %v366_v41, 128  ;;  %v368_v42 = vpop.f32.mrb[1].mxu0 }
 0x10a   : > { %654 = vxpose.xlu1.b32.start [1/8] (short) %v368_v42, 128  ;;  %v370_v43 = vpop.f32.mrb[2].mxu0 }
 0x10b   : > { %v372_v44 = vpop.f32.mrb[3].mxu0 }
 0x10d   : > { %623 = vxpose.xlu0.b32.cont [2/8] (short) %v370_v43, 128 }
 0x10e   : > { %655 = vxpose.xlu1.b32.cont [2/8] (short) %v372_v44, 128 }
 0x110   : > { %v376_v45 = vpop.f32.mrb[4].mxu0 }
 0x111   : > { %624 = vxpose.xlu0.b32.cont [3/8] (short) %v376_v45, 128  ;;  %v378_v46 = vpop.f32.mrb[5].mxu0 }
 0x112   : > { %656 = vxpose.xlu1.b32.cont [3/8] (short) %v378_v46, 128  ;;  %v380_v47 = vpop.f32.mrb[6].mxu0 }
 0x113   : > { %v382_v48 = vpop.f32.mrb[7].mxu0 }
 0x115   : > { %625 = vxpose.xlu0.b32.cont [4/8] (short) %v380_v47, 128 }
 0x116   : > { %657 = vxpose.xlu1.b32.cont [4/8] (short) %v382_v48, 128 }
 0x118   : > { %v386_v49 = vpop.f32.mrb[8].mxu0 }
 0x119   : > { %626 = vxpose.xlu0.b32.cont [5/8] (short) %v386_v49, 128  ;;  %v388_v50 = vpop.f32.mrb[9].mxu0 }
 0x11a   : > { %658 = vxpose.xlu1.b32.cont [5/8] (short) %v388_v50, 128  ;;  %v390_v51 = vpop.f32.mrb[10].mxu0 }
 0x11b   : > { %v392_v52 = vpop.f32.mrb[11].mxu0 }
 0x11d   : > { %627 = vxpose.xlu0.b32.cont [6/8] (short) %v390_v51, 128 }
 0x11e   : > { %659 = vxpose.xlu1.b32.cont [6/8] (short) %v392_v52, 128 }
 0x120   : > { %v396_v53 = vpop.f32.mrb[12].mxu0 }
 0x121   : > { %628 = vxpose.xlu0.b32.cont [7/8] (short) %v396_v53, 128  ;;  %v398_v54 = vpop.f32.mrb[13].mxu0 }
 0x122   : > { %660 = vxpose.xlu1.b32.cont [7/8] (short) %v398_v54, 128  ;;  %v400_v55 = vpop.f32.mrb[14].mxu0 }
 0x123   : > { %v402_v56 = vpop.f32.mrb[15].mxu0 }
 0x125   : > { %629 = vxpose.xlu0.b32.end [8/8] (short) %v400_v55, 128 }
 0x126   : > { %661 = vxpose.xlu1.b32.end [8/8] (short) %v402_v56, 128 }
 0x128   : > { %v406_v57 = vpop.f32.mrb[16].mxu0 }
 0x129   : > { %v408_v58 = vpop.f32.mrb[17].mxu0 }
 0x12a   : > { %v410_v59 = vpop.f32.mrb[18].mxu0 }
 0x12b   : > { %v702_v60 = vpack.c.bf16 %v410_v59, %v406_v57  ;;  %v412_v61 = vpop.f32.mrb[19].mxu0  ;;  %v1817_v59 = vld [vmem:[%s3112_s2 + $0x20] sm:$0xff]  }
 0x12c   : > { %v703_v62 = vpack.c.bf16 %v412_v61, %v408_v58  ;;  %582 = vmatmul.mubr.bf16.gmra.mrb[16].mxu1 %v1817_v59 }
 0x12d   : > { %591 = vmatprep.mubr.bf16.mxu1 %v1977_v0 }
 0x12e   : > { %759 = vmatprep.subr.bf16.mxu0 %v703_v62  ;;  %v1818_v62 = vld [vmem:[%s3112_s2 + $0x28] sm:$0xff]  }
 0x12f   : > { %760 = vmatpush1.bf16.msra.mxu0 %v702_v60 }
 0x130   : > { %v416_v63 = vpop.f32.mrb[20].mxu0 }
 0x131   : > { %v418_v1 = vpop.f32.mrb[21].mxu0 }
 0x132   : > { %v420_v2 = vpop.f32.mrb[22].mxu0 }
 0x133   : > { %v704_v3 = vpack.c.bf16 %v420_v2, %v416_v63  ;;  %v422_v4 = vpop.f32.mrb[23].mxu0 }
 0x134   : > { %v705_v5 = vpack.c.bf16 %v422_v4, %v418_v1  ;;  %592 = vmatmul.mubr.bf16.gmra.mrb[20].mxu1 %v1818_v62 }
 0x135   : > { %601 = vmatprep.mubr.bf16.mxu1 %v1977_v0 }
 0x136   : > { %761 = vmatprep.subr.bf16.mxu0 %v705_v5 }
 0x137   : > { %762 = vmatpush1.bf16.msra.mxu0 %v704_v3  ;;  %v1819_v3 = vld [vmem:[%s3112_s2 + $0x30] sm:$0xff]  }
 0x138   : > { %v426_v6 = vpop.f32.mrb[24].mxu0 }
 0x139   : > { %v428_v7 = vpop.f32.mrb[25].mxu0 }
 0x13a   : > { %v430_v8 = vpop.f32.mrb[26].mxu0 }
 0x13b   : > { %v706_v9 = vpack.c.bf16 %v430_v8, %v426_v6  ;;  %v432_v10 = vpop.f32.mrb[27].mxu0  ;;  %v1820_v6 = vld [vmem:[%s3112_s2 + $0x38] sm:$0xff]  }
 0x13c   : > { %v707_v11 = vpack.c.bf16 %v432_v10, %v428_v7  ;;  %602 = vmatmul.mubr.bf16.gmra.mrb[24].mxu1 %v1819_v3 }
 0x13d   : > { %611 = vmatprep.mubr.bf16.mxu1 %v1977_v0 }
 0x13e   : > { %763 = vmatprep.subr.bf16.mxu0 %v707_v11 }
 0x13f   : > { %764 = vmatpush1.bf16.msra.mxu0 %v706_v9 }
 0x140   : > { %v436_v12 = vpop.f32.mrb[28].mxu0 }
 0x141   : > { %v438_v13 = vpop.f32.mrb[29].mxu0 }
 0x142   : > { %v440_v14 = vpop.f32.mrb[30].mxu0 }
 0x143   : > { %v708_v15 = vpack.c.bf16 %v440_v14, %v436_v12  ;;  %v442_v16 = vpop.f32.mrb[31].mxu0 }
 0x144   : > { %v709_v17 = vpack.c.bf16 %v442_v16, %v438_v13  ;;  %612 = vmatmul.mubr.bf16.gmra.mrb[28].mxu1 %v1820_v6 }
 0x146   : > { %765 = vmatprep.subr.bf16.mxu0 %v709_v17 }
 0x147   : > { %766 = vmatpush1.bf16.msra.mxu0 %v708_v15 }
 0x189   : > { %v638_v19 = vpop.trf.xlu0 }
 0x18a   : > { %v670_v35 = vpop.trf.xlu1 }
 0x18d   : > { %v639_v20 = vpop.trf.xlu0 }
 0x18e   : > { %v686_v21 = vpack.c.bf16 %v639_v20, %v638_v19  ;;  %v671_v38 = vpop.trf.xlu1 }
 0x18f   : > { %v694_v53 = vpack.c.bf16 %v671_v38, %v670_v35 }
 0x190   : > { %1727 = vmatmul.mubr.msk.bf16.vlgmr.msra.gmra.mrb[32].mxu0 %vm710_vm0, %v686_v21 }
 0x191   : > { %v640_v23 = vpop.trf.xlu0  ;;  %801 = vmatprep.mubr.bf16.mxu0 %v1977_v0 }
 0x192   : > { %v672_v41 = vpop.trf.xlu1 }
 0x195   : > { %v641_v24 = vpop.trf.xlu0 }
 0x196   : > { %v687_v25 = vpack.c.bf16 %v641_v24, %v640_v23  ;;  %v673_v44 = vpop.trf.xlu1 }
 0x197   : > { %v695_v55 = vpack.c.bf16 %v673_v44, %v672_v41 }
 0x198   : > { %1728 = vmatmul.mubr.msk.bf16.gmra.mrb[36].mxu0 %vm710_vm0, %v687_v25 }
 0x199   : > { %v642_v27 = vpop.trf.xlu0  ;;  %811 = vmatprep.mubr.bf16.mxu0 %v1977_v0 }
 0x19a   : > { %v674_v48 = vpop.trf.xlu1 }
 0x19d   : > { %v643_v28 = vpop.trf.xlu0 }
 0x19e   : > { %v688_v29 = vpack.c.bf16 %v643_v28, %v642_v27  ;;  %v675_v51 = vpop.trf.xlu1 }
 0x19f   : > { %v696_v57 = vpack.c.bf16 %v675_v51, %v674_v48 }
 0x1a0   : > { %1729 = vmatmul.mubr.msk.bf16.gmra.mrb[40].mxu0 %vm710_vm0, %v688_v29 }
 0x1a1   : > { %v644_v31 = vpop.trf.xlu0  ;;  %821 = vmatprep.mubr.bf16.mxu0 %v1977_v0 }
 0x1a2   : > { %v676_v52 = vpop.trf.xlu1 }
 0x1a5   : > { %v645_v32 = vpop.trf.xlu0 }
 0x1a6   : > { %v689_v33 = vpack.c.bf16 %v645_v32, %v644_v31  ;;  %v677_v54 = vpop.trf.xlu1 }
 0x1a7   : > { %v697_v61 = vpack.c.bf16 %v677_v54, %v676_v52 }
 0x1a8   : > { %1730 = vmatmul.mubr.msk.bf16.gmra.mrb[44].mxu0 %vm710_vm0, %v689_v33 }
 0x1a9   : > { %v646_v34 = vpop.trf.xlu0  ;;  %831 = vmatprep.mubr.bf16.mxu0 %v1977_v0 }
 0x1aa   : > { %v678_v56 = vpop.trf.xlu1 }
 0x1ad   : > { %v647_v36 = vpop.trf.xlu0 }
 0x1ae   : > { %v690_v37 = vpack.c.bf16 %v647_v36, %v646_v34  ;;  %v679_v58 = vpop.trf.xlu1 }
 0x1af   : > { %v698_v1 = vpack.c.bf16 %v679_v58, %v678_v56 }
 0x1b0   : > { %1731 = vmatmul.mubr.msk.bf16.gmra.mrb[48].mxu0 %vm710_vm0, %v690_v37 }
 0x1b1   : > { %v648_v39 = vpop.trf.xlu0  ;;  %841 = vmatprep.mubr.bf16.mxu0 %v1977_v0 }
 0x1b2   : > { %v680_v60 = vpop.trf.xlu1 }
 0x1b5   : > { %v649_v40 = vpop.trf.xlu0 }
 0x1b6   : > { %v691_v42 = vpack.c.bf16 %v649_v40, %v648_v39  ;;  %v681_v63 = vpop.trf.xlu1 }
 0x1b7   : > { %v699_v4 = vpack.c.bf16 %v681_v63, %v680_v60 }
 0x1b8   : > { %1732 = vmatmul.mubr.msk.bf16.gmra.mrb[52].mxu0 %vm710_vm0, %v691_v42 }
 0x1b9   : > { %v650_v43 = vpop.trf.xlu0  ;;  %851 = vmatprep.mubr.bf16.mxu0 %v1977_v0 }
 0x1ba   : > { %v682_v2 = vpop.trf.xlu1 }
 0x1bd   : > { %v651_v45 = vpop.trf.xlu0 }
 0x1be   : > { %v692_v46 = vpack.c.bf16 %v651_v45, %v650_v43  ;;  %v683_v5 = vpop.trf.xlu1 }
 0x1bf   : > { %v700_v8 = vpack.c.bf16 %v683_v5, %v682_v2 }
 0x1c0   : > { %1733 = vmatmul.mubr.msk.bf16.gmra.mrb[56].mxu0 %vm710_vm0, %v692_v46 }
 0x1c1   : > { %v652_v47 = vpop.trf.xlu0  ;;  %861 = vmatprep.mubr.bf16.mxu0 %v1977_v0 }
 0x1c2   : > { %v684_v7 = vpop.trf.xlu1 }
 0x1c5   : > { %v653_v49 = vpop.trf.xlu0 }
 0x1c6   : > { %v693_v50 = vpack.c.bf16 %v653_v49, %v652_v47  ;;  %v685_v9 = vpop.trf.xlu1 }
 0x1c7   : > { %v701_v10 = vpack.c.bf16 %v685_v9, %v684_v7 }
 0x1c8   : > { %1734 = vmatmul.mubr.msk.bf16.gmra.mrb[60].mxu0 %vm710_vm0, %v693_v50 }
 0x1c9   : > { %871 = vmatprep.mubr.bf16.mxu0 %v1977_v0 }
 0x1d0   : > { %1735 = vmatmul.mubr.msk.bf16.gmra.mrb[64].mxu0 %vm710_vm0, %v694_v53 }
 0x1d1   : > { %881 = vmatprep.mubr.bf16.mxu0 %v1977_v0 }
 0x1d8   : > { %1736 = vmatmul.mubr.msk.bf16.gmra.mrb[68].mxu0 %vm710_vm0, %v695_v55 }
 0x1d9   : > { %891 = vmatprep.mubr.bf16.mxu0 %v1977_v0 }
 0x1e0   : > { %1737 = vmatmul.mubr.msk.bf16.gmra.mrb[72].mxu0 %vm710_vm0, %v696_v57 }
 0x1e1   : > { %901 = vmatprep.mubr.bf16.mxu0 %v1977_v0 }
 0x1e8   : > { %1738 = vmatmul.mubr.msk.bf16.gmra.mrb[76].mxu0 %vm710_vm0, %v697_v61 }
 0x1e9   : > { %911 = vmatprep.mubr.bf16.mxu0 %v1977_v0 }
 0x1f0   : > { %1739 = vmatmul.mubr.msk.bf16.gmra.mrb[80].mxu0 %vm710_vm0, %v698_v1 }
 0x1f1   : > { %921 = vmatprep.mubr.bf16.mxu0 %v1977_v0 }
 0x1f8   : > { %1740 = vmatmul.mubr.msk.bf16.gmra.mrb[84].mxu0 %vm710_vm0, %v699_v4 }
 0x1f9   : > { %931 = vmatprep.mubr.bf16.mxu0 %v1977_v0 }
 0x200   : > { %1741 = vmatmul.mubr.msk.bf16.gmra.mrb[88].mxu0 %vm710_vm0, %v700_v8 }
 0x201   : > { %941 = vmatprep.mubr.bf16.mxu0 %v1977_v0 }
 0x208   : > { %1742 = vmatmul.mubr.msk.bf16.gmra.mrb[92].mxu0 %vm710_vm0, %v701_v10 }
 0x263   : > { %v2128_v11 = vpop.f32.mrb[32].mxu0 }
 0x264   : > { %v2130_v12 = vpop.f32.mrb[33].mxu0 }
 0x265   : > { %v2132_v13 = vpop.f32.mrb[34].mxu0 }
 0x266   : > { %v2134_v14 = vpop.f32.mrb[35].mxu0 }
 0x26b   : > { %v2136_v15 = vpop.f32.mrb[36].mxu0 }
 0x26c   : > { %v952_v16 = vmax.f32 %v2128_v11, %v2136_v15  ;;  %v2140_v17 = vpop.f32.mrb[37].mxu0 }
 0x26d   : > { %v989_v0 = vmax.f32 %v2130_v12, %v2140_v17  ;;  %v2144_v18 = vpop.f32.mrb[38].mxu0 }
 0x26e   : > { %v953_v19 = vmax.f32 %v2132_v13, %v2144_v18  ;;  %v2148_v20 = vpop.f32.mrb[39].mxu0 }
 0x26f   : > { %v990_v21 = vmax.f32 %v2134_v14, %v2148_v20 }
 0x273   : > { %v2152_v22 = vpop.f32.mrb[40].mxu0 }
 0x274   : > { %v954_v23 = vmax.f32 %v952_v16, %v2152_v22  ;;  %v2155_v24 = vpop.f32.mrb[41].mxu0 }
 0x275   : > { %v991_v25 = vmax.f32 %v989_v0, %v2155_v24  ;;  %v2158_v26 = vpop.f32.mrb[42].mxu0 }
 0x276   : > { %v955_v27 = vmax.f32 %v953_v19, %v2158_v26  ;;  %v2161_v28 = vpop.f32.mrb[43].mxu0 }
 0x277   : > { %v992_v29 = vmax.f32 %v990_v21, %v2161_v28 }
 0x27b   : > { %v2164_v30 = vpop.f32.mrb[44].mxu0 }
 0x27c   : > { %v956_v31 = vmax.f32 %v954_v23, %v2164_v30  ;;  %v2167_v32 = vpop.f32.mrb[45].mxu0 }
 0x27d   : > { %v993_v33 = vmax.f32 %v991_v25, %v2167_v32  ;;  %v2170_v34 = vpop.f32.mrb[46].mxu0 }
 0x27e   : > { %v957_v35 = vmax.f32 %v955_v27, %v2170_v34  ;;  %v2173_v36 = vpop.f32.mrb[47].mxu0 }
 0x27f   : > { %v994_v37 = vmax.f32 %v992_v29, %v2173_v36 }
 0x283   : > { %v2176_v38 = vpop.f32.mrb[48].mxu0 }
 0x284   : > { %v958_v39 = vmax.f32 %v956_v31, %v2176_v38  ;;  %v2179_v40 = vpop.f32.mrb[49].mxu0 }
 0x285   : > { %v995_v41 = vmax.f32 %v993_v33, %v2179_v40  ;;  %v2182_v42 = vpop.f32.mrb[50].mxu0 }
 0x286   : > { %v959_v43 = vmax.f32 %v957_v35, %v2182_v42  ;;  %v2185_v44 = vpop.f32.mrb[51].mxu0 }
 0x287   : > { %v996_v45 = vmax.f32 %v994_v37, %v2185_v44 }
 0x28b   : > { %v2188_v46 = vpop.f32.mrb[52].mxu0 }
 0x28c   : > { %v960_v47 = vmax.f32 %v958_v39, %v2188_v46  ;;  %v2191_v48 = vpop.f32.mrb[53].mxu0 }
 0x28d   : > { %v997_v49 = vmax.f32 %v995_v41, %v2191_v48  ;;  %v2194_v50 = vpop.f32.mrb[54].mxu0 }
 0x28e   : > { %v961_v51 = vmax.f32 %v959_v43, %v2194_v50  ;;  %v2197_v52 = vpop.f32.mrb[55].mxu0 }
 0x28f   : > { %3158 = vst [vmem:[#allocation2_spill] sm:$0xff] %v2197_v52  ;;  %v998_v53 = vmax.f32 %v996_v45, %v2197_v52 }
 0x293   : > { %v2200_v54 = vpop.f32.mrb[56].mxu0 }
 0x294   : > { %v962_v55 = vmax.f32 %v960_v47, %v2200_v54  ;;  %v2203_v56 = vpop.f32.mrb[57].mxu0 }
 0x295   : > { %3159 = vst [vmem:[#allocation3_spill] sm:$0xff] %v2203_v56  ;;  %v999_v57 = vmax.f32 %v997_v49, %v2203_v56  ;;  %v2206_v58 = vpop.f32.mrb[58].mxu0 }
 0x296   : > { %v963_v59 = vmax.f32 %v961_v51, %v2206_v58  ;;  %v2209_v60 = vpop.f32.mrb[59].mxu0 }
 0x297   : > { %3160 = vst [vmem:[#allocation4_spill] sm:$0xff] %v2209_v60  ;;  %v1000_v61 = vmax.f32 %v998_v53, %v2209_v60 }
 0x29b   : > { %v2212_v62 = vpop.f32.mrb[60].mxu0 }
 0x29c   : > { %v964_v63 = vmax.f32 %v962_v55, %v2212_v62  ;;  %v2215_v1 = vpop.f32.mrb[61].mxu0 }
 0x29d   : > { %3161 = vst [vmem:[#allocation5_spill] sm:$0xff] %v2215_v1  ;;  %v1001_v2 = vmax.f32 %v999_v57, %v2215_v1  ;;  %v2218_v3 = vpop.f32.mrb[62].mxu0 }
 0x29e   : > { %v965_v4 = vmax.f32 %v963_v59, %v2218_v3  ;;  %v2221_v5 = vpop.f32.mrb[63].mxu0 }
 0x29f   : > { %3162 = vst [vmem:[#allocation6_spill] sm:$0xff] %v2221_v5  ;;  %v1002_v6 = vmax.f32 %v1000_v61, %v2221_v5 }
 0x2a3   : > { %v2224_v7 = vpop.f32.mrb[64].mxu0 }
 0x2a4   : > { %v966_v8 = vmax.f32 %v964_v63, %v2224_v7  ;;  %v2227_v9 = vpop.f32.mrb[65].mxu0 }
 0x2a5   : > { %3163 = vst [vmem:[#allocation7_spill] sm:$0xff] %v2227_v9  ;;  %v1003_v10 = vmax.f32 %v1001_v2, %v2227_v9  ;;  %v2230_v16 = vpop.f32.mrb[66].mxu0 }
 0x2a6   : > { %v967_v0 = vmax.f32 %v965_v4, %v2230_v16  ;;  %v2233_v19 = vpop.f32.mrb[67].mxu0 }
 0x2a7   : > { %3164 = vst [vmem:[#allocation8_spill] sm:$0xff] %v2233_v19  ;;  %v1004_v21 = vmax.f32 %v1002_v6, %v2233_v19 }
 0x2ab   : > { %v2236_v23 = vpop.f32.mrb[68].mxu0 }
 0x2ac   : > { %v968_v25 = vmax.f32 %v966_v8, %v2236_v23  ;;  %v2239_v27 = vpop.f32.mrb[69].mxu0 }
 0x2ad   : > { %3165 = vst [vmem:[#allocation9_spill] sm:$0xff] %v2239_v27  ;;  %v1005_v29 = vmax.f32 %v1003_v10, %v2239_v27  ;;  %v2242_v31 = vpop.f32.mrb[70].mxu0 }
 0x2ae   : > { %v969_v33 = vmax.f32 %v967_v0, %v2242_v31  ;;  %v2245_v35 = vpop.f32.mrb[71].mxu0 }
 0x2af   : > { %3166 = vst [vmem:[#allocation10_spill] sm:$0xff] %v2245_v35  ;;  %v1006_v37 = vmax.f32 %v1004_v21, %v2245_v35 }
 0x2b3   : > { %v2248_v39 = vpop.f32.mrb[72].mxu0 }
 0x2b4   : > { %v970_v41 = vmax.f32 %v968_v25, %v2248_v39  ;;  %v2251_v43 = vpop.f32.mrb[73].mxu0 }
 0x2b5   : > { %3167 = vst [vmem:[#allocation11_spill] sm:$0xff] %v2251_v43  ;;  %v1007_v45 = vmax.f32 %v1005_v29, %v2251_v43  ;;  %v2254_v47 = vpop.f32.mrb[74].mxu0 }
 0x2b6   : > { %v971_v49 = vmax.f32 %v969_v33, %v2254_v47  ;;  %v2257_v51 = vpop.f32.mrb[75].mxu0 }
 0x2b7   : > { %3168 = vst [vmem:[#allocation12_spill] sm:$0xff] %v2257_v51  ;;  %v1008_v53 = vmax.f32 %v1006_v37, %v2257_v51 }
 0x2bb   : > { %v2260_v55 = vpop.f32.mrb[76].mxu0 }
 0x2bc   : > { %v972_v57 = vmax.f32 %v970_v41, %v2260_v55  ;;  %v2263_v59 = vpop.f32.mrb[77].mxu0 }
 0x2bd   : > { %3169 = vst [vmem:[#allocation13_spill] sm:$0xff] %v2263_v59  ;;  %v1009_v61 = vmax.f32 %v1007_v45, %v2263_v59  ;;  %v2266_v63 = vpop.f32.mrb[78].mxu0 }
 0x2be   : > { %v973_v2 = vmax.f32 %v971_v49, %v2266_v63  ;;  %v2269_v4 = vpop.f32.mrb[79].mxu0 }
 0x2bf   : > { %3170 = vst [vmem:[#allocation14_spill] sm:$0xff] %v2269_v4  ;;  %v1010_v6 = vmax.f32 %v1008_v53, %v2269_v4 }
 0x2c3   : > { %v2272_v8 = vpop.f32.mrb[80].mxu0 }
 0x2c4   : > { %v974_v10 = vmax.f32 %v972_v57, %v2272_v8  ;;  %v2275_v0 = vpop.f32.mrb[81].mxu0 }
 0x2c5   : > { %3171 = vst [vmem:[#allocation15_spill] sm:$0xff] %v2275_v0  ;;  %v1011_v21 = vmax.f32 %v1009_v61, %v2275_v0  ;;  %v2278_v25 = vpop.f32.mrb[82].mxu0 }
 0x2c6   : > { %v975_v29 = vmax.f32 %v973_v2, %v2278_v25  ;;  %v2281_v33 = vpop.f32.mrb[83].mxu0 }
 0x2c7   : > { %3172 = vst [vmem:[#allocation16_spill] sm:$0xff] %v2281_v33  ;;  %v1012_v37 = vmax.f32 %v1010_v6, %v2281_v33 }
 0x2cb   : > { %v2284_v41 = vpop.f32.mrb[84].mxu0 }
 0x2cc   : > { %v976_v45 = vmax.f32 %v974_v10, %v2284_v41  ;;  %v2287_v49 = vpop.f32.mrb[85].mxu0 }
 0x2cd   : > { %3173 = vst [vmem:[#allocation17_spill] sm:$0xff] %v2287_v49  ;;  %v1013_v53 = vmax.f32 %v1011_v21, %v2287_v49  ;;  %v2290_v57 = vpop.f32.mrb[86].mxu0 }
 0x2ce   : > { %v977_v61 = vmax.f32 %v975_v29, %v2290_v57  ;;  %v2293_v0 = vpop.f32.mrb[87].mxu0 }
 0x2cf   : > { %3174 = vst [vmem:[#allocation18_spill] sm:$0xff] %v2293_v0  ;;  %v1014_v2 = vmax.f32 %v1012_v37, %v2293_v0 }
 0x2d3   : > { %v2296_v4 = vpop.f32.mrb[88].mxu0 }
 0x2d4   : > { %v978_v6 = vmax.f32 %v976_v45, %v2296_v4  ;;  %v2299_v33 = vpop.f32.mrb[89].mxu0 }
 0x2d5   : > { %3175 = vst [vmem:[#allocation19_spill] sm:$0xff] %v2299_v33  ;;  %v1015_v10 = vmax.f32 %v1013_v53, %v2299_v33  ;;  %v2302_v59 = vpop.f32.mrb[90].mxu0 }
 0x2d6   : > { %v979_v21 = vmax.f32 %v977_v61, %v2302_v59  ;;  %v2305_v49 = vpop.f32.mrb[91].mxu0 }
 0x2d7   : > { %3176 = vst [vmem:[#allocation20_spill] sm:$0xff] %v2305_v49  ;;  %v1016_v29 = vmax.f32 %v1014_v2, %v2305_v49 }
 0x2db   : > { %v2308_v51 = vpop.f32.mrb[92].mxu0 }
 0x2dc   : > { %v980_v37 = vmax.f32 %v978_v6, %v2308_v51  ;;  %v2311_v0 = vpop.f32.mrb[93].mxu0 }
 0x2dd   : > { %3177 = vst [vmem:[#allocation21_spill] sm:$0xff] %v2311_v0  ;;  %v1017_v45 = vmax.f32 %v1015_v10, %v2311_v0  ;;  %v2314_v43 = vpop.f32.mrb[94].mxu0 }
 0x2de   : > { %v981_v53 = vmax.f32 %v979_v21, %v2314_v43  ;;  %v2317_v33 = vpop.f32.mrb[95].mxu0 }
 0x2df   : > { %3178 = vst [vmem:[#allocation22_spill] sm:$0xff] %v2317_v33  ;;  %v1018_v61 = vmax.f32 %v1016_v29, %v2317_v33 }
 0x2e0   : > { %v982_v35 = vmax.f32 %v980_v37, %v981_v53 }
 0x2e1   : > { %v1019_v27 = vmax.f32 %v1017_v45, %v1018_v61 }
 0x2e2   : > { %v983_v19 = vrot.slane %v982_v35, 4 }
 0x2e3   : > { %v1020_v2 = vrot.slane %v1019_v27, 4 }
 0x2e4   : > { %v984_v49 = vmax.f32 %v982_v35, %v983_v19 }
 0x2e5   : > { %v1021_v9 = vmax.f32 %v1019_v27, %v1020_v2 }
 0x2e6   : > { %v985_v5 = vrot.slane %v984_v49, 2 }
 0x2e7   : > { %v1022_v6 = vrot.slane %v1021_v9, 2 }
 0x2e8   : > { %v986_v1 = vmax.f32 %v984_v49, %v985_v5  ;;  %v2332_v5 = vpop.f32.mrb[0].mxu1 }
 0x2e9   : > { %v1023_v60 = vmax.f32 %v1021_v9, %v1022_v6  ;;  %3179 = vst [vmem:[#allocation23_spill] sm:$0xff] %v2332_v5  ;;  %v3211_v5 = vld [vmem:[#allocation21_spill] sm:$0xff] }
 0x2ea   : > { %v987_v56 = vrot.slane %v986_v1, 1 }
 0x2eb   : > { %v1024_v10 = vrot.slane %v1023_v60, 1 }
 0x2ec   : > { %v2320_v0 = vmax.f32 %v986_v1, %v987_v56  ;;  %v2342_v1 = vpop.f32.mrb[1].mxu1 }
 0x2ed   : > { %v2322_v52 = vmax.f32 %v1023_v60, %v1024_v10  ;;  %3180 = vst [vmem:[#allocation24_spill] sm:$0xff] %v2342_v1 }
 0x2ee   : > { %v1026_v21 = vsub.f32 %v2128_v11, %v2320_v0  ;;  %v1028_v29 = vsub.f32 %v2132_v13, %v2320_v0  ;;  %v1030_v19 = vsub.f32 %v2136_v15, %v2320_v0  ;;  %v1032_v27 = vsub.f32 %v2144_v18, %v2320_v0 }
 0x2ef   : > { %v1034_v56 = vsub.f32 %v2152_v22, %v2320_v0  ;;  %v1036_v60 = vsub.f32 %v2158_v26, %v2320_v0  ;;  %v1038_v11 = vsub.f32 %v2164_v30, %v2320_v0  ;;  %v1040_v13 = vsub.f32 %v2170_v34, %v2320_v0 }
 0x2f0   : > { %v1042_v15 = vsub.f32 %v2176_v38, %v2320_v0  ;;  %v1044_v18 = vsub.f32 %v2182_v42, %v2320_v0  ;;  %v1046_v22 = vsub.f32 %v2188_v46, %v2320_v0  ;;  %v1048_v26 = vsub.f32 %v2194_v50, %v2320_v0 }
 0x2f1   : > { %v1050_v30 = vsub.f32 %v2200_v54, %v2320_v0  ;;  %v1052_v34 = vsub.f32 %v2206_v58, %v2320_v0  ;;  %v1054_v9 = vsub.f32 %v2212_v62, %v2320_v0  ;;  %v1056_v38 = vsub.f32 %v2218_v3, %v2320_v0 }
 0x2f2   : > { %v1058_v42 = vsub.f32 %v2224_v7, %v2320_v0  ;;  %v1060_v46 = vsub.f32 %v2230_v16, %v2320_v0  ;;  %v1062_v50 = vsub.f32 %v2236_v23, %v2320_v0  ;;  %v1064_v54 = vsub.f32 %v2242_v31, %v2320_v0  ;;  %v3197_v31 = vld [vmem:[#allocation11_spill] sm:$0xff] }
 0x2f3   : > { %v1066_v58 = vsub.f32 %v2248_v39, %v2320_v0  ;;  %v1068_v62 = vsub.f32 %v2254_v47, %v2320_v0  ;;  %v1070_v3 = vsub.f32 %v2260_v55, %v2320_v0  ;;  %v1072_v7 = vsub.f32 %v2266_v63, %v2320_v0 }
 0x2f4   : > { %v1090_v49 = vmul.f32 1.442695, %v1026_v21  ;;  %v1094_v37 = vmul.f32 1.442695, %v1028_v29  ;;  %v1098_v45 = vmul.f32 1.442695, %v1030_v19  ;;  %v3213_v23 = vsub.f32 %v2272_v8, %v2320_v0 }
 0x2f5   : > { %v1102_v61 = vmul.f32 1.442695, %v1032_v27  ;;  %v1106_v6 = vmul.f32 1.442695, %v1034_v56  ;;  %v1110_v10 = vmul.f32 1.442695, %v1036_v60  ;;  %v3216_v8 = vsub.f32 %v2284_v41, %v2320_v0 }
 0x2f6   : > { %1821 = vpow2.f32 %v1090_v49  ;;  %v1114_v47 = vmul.f32 1.442695, %v1038_v11  ;;  %v1118_v55 = vmul.f32 1.442695, %v1040_v13  ;;  %v1122_v39 = vmul.f32 1.442695, %v1042_v15 }
 0x2f7   : > { %1823 = vpow2.f32 %v1094_v37  ;;  %v1126_v63 = vmul.f32 1.442695, %v1044_v18  ;;  %v1130_v21 = vmul.f32 1.442695, %v1046_v22  ;;  %v1134_v29 = vmul.f32 1.442695, %v1048_v26 }
 0x2f8   : > { %1825 = vpow2.f32 %v1098_v45  ;;  %v1138_v19 = vmul.f32 1.442695, %v1050_v30  ;;  %v1142_v53 = vmul.f32 1.442695, %v1052_v34  ;;  %v1146_v27 = vmul.f32 1.442695, %v1054_v9 }
 0x2f9   : > { %1827 = vpow2.f32 %v1102_v61  ;;  %v1150_v35 = vmul.f32 1.442695, %v1056_v38  ;;  %v1154_v2 = vmul.f32 1.442695, %v1058_v42  ;;  %v1158_v49 = vmul.f32 1.442695, %v1060_v46 }
 0x2fa   : > { %1829 = vpow2.f32 %v1106_v6  ;;  %v2396_v56 = vmul.f32 1.442695, %v1062_v50  ;;  %v2398_v60 = vmul.f32 1.442695, %v1064_v54  ;;  %v2400_v11 = vmul.f32 1.442695, %v1066_v58 }
 0x2fb   : > { %1831 = vpow2.f32 %v1110_v10  ;;  %v2402_v13 = vmul.f32 1.442695, %v1068_v62  ;;  %v2404_v15 = vmul.f32 1.442695, %v1070_v3  ;;  %v2406_v18 = vmul.f32 1.442695, %v1072_v7 }
 0x2fc   : > { %1833 = vpow2.f32 %v1114_v47  ;;  %v2410_v26 = vpop.f32.mrb[2].mxu1  ;;  %v3186_v45 = vld [vmem:[#allocation3_spill] sm:$0xff]  ;;  %v3187_v6 = vld [vmem:[#allocation4_spill] sm:$0xff]  ;;  %v3189_v47 = vld [vmem:[#allocation5_spill] sm:$0xff] }
 0x2fd   : > { %1835 = vpow2.f32 %v1118_v55  ;;  %3181 = vst [vmem:[#allocation25_spill] sm:$0xff] %v2410_v26  ;;  %v2418_v38 = vpop.f32.mrb[3].mxu1  ;;  %v3190_v3 = vld [vmem:[#allocation6_spill] sm:$0xff]  ;;  %v3191_v54 = vld [vmem:[#allocation7_spill] sm:$0xff]  ;;  %v3193_v9 = vld [vmem:[#allocation8_spill] sm:$0xff] }
 0x2fe   : > { %1837 = vpow2.f32 %v1122_v39  ;;  %3182 = vst [vmem:[#allocation26_spill] sm:$0xff] %v2418_v38  ;;  %v2428_v58 = vpop.f32.mrb[4].mxu1  ;;  %v3184_v39 = vld [vmem:[#allocation2_spill] sm:$0xff] }
 0x2ff   : > { %1839 = vpow2.f32 %v1126_v63  ;;  %3183 = vst [vmem:[#allocation27_spill] sm:$0xff] %v2428_v58  ;;  %v2438_v55 = vpop.f32.mrb[5].mxu1  ;;  %v3196_v50 = vld [vmem:[#allocation10_spill] sm:$0xff] }
 0x300   : > { %v2420_v42 = vpop.eup %1821  ;;  %1841 = vpow2.f32 %v1130_v21  ;;  %3185 = vst [vmem:[#allocation2_spill] sm:$0xff] %v2438_v55  ;;  %v2448_v21 = vpop.f32.mrb[6].mxu1 }
 0x301   : > { %v2430_v62 = vpop.eup %1823  ;;  %1843 = vpow2.f32 %v1134_v29  ;;  %3188 = vst [vmem:[#allocation3_spill] sm:$0xff] %v2448_v21  ;;  %v2458_v46 = vpop.f32.mrb[7].mxu1 }
 0x302   : > { %v2440_v63 = vpop.eup %1825  ;;  %1845 = vpow2.f32 %v1138_v19  ;;  %v1218_v37 = vadd.f32 %v2430_v62, %v2420_v42  ;;  %3192 = vst [vmem:[#allocation4_spill] sm:$0xff] %v2458_v46  ;;  %v2467_v7 = vpop.f32.mrb[8].mxu1  ;;  %v3200_v46 = vld [vmem:[#allocation13_spill] sm:$0xff] }
 0x303   : > { %v2450_v29 = vpop.eup %1827  ;;  %1847 = vpow2.f32 %v1142_v53  ;;  %v3194_v53 = vld [vmem:[#allocation9_spill] sm:$0xff]  ;;  %3195 = vst [vmem:[#allocation5_spill] sm:$0xff] %v2467_v7  ;;  %v2477_v16 = vpop.f32.mrb[9].mxu1 }
 0x304   : > { %v2460_v61 = vpop.eup %1829  ;;  %1849 = vpow2.f32 %v1146_v27  ;;  %v1219_v10 = vadd.f32 %v2440_v63, %v1218_v37  ;;  %v3198_v27 = vld [vmem:[#allocation12_spill] sm:$0xff]  ;;  %3199 = vst [vmem:[#allocation6_spill] sm:$0xff] %v2477_v16  ;;  %v2486_v19 = vpop.f32.mrb[10].mxu1  ;;  %v3203_v37 = vld [vmem:[#allocation15_spill] sm:$0xff] }
 0x305   : > { %v2469_v22 = vpop.eup %1831  ;;  %1851 = vpow2.f32 %v1150_v35  ;;  %v3201_v35 = vld [vmem:[#allocation14_spill] sm:$0xff]  ;;  %3202 = vst [vmem:[#allocation7_spill] sm:$0xff] %v2486_v19  ;;  %v3204_v16 = vld [vmem:[#allocation16_spill] sm:$0xff]  ;;  %v2496_v21 = vpop.f32.mrb[11].mxu1 }
 0x306   : > { %v2479_v34 = vpop.eup %1833  ;;  %1853 = vpow2.f32 %v1154_v2  ;;  %v1220_v30 = vadd.f32 %v2450_v29, %v1219_v10  ;;  %3206 = vst [vmem:[#allocation8_spill] sm:$0xff] %v2496_v21  ;;  %v3207_v19 = vld [vmem:[#allocation18_spill] sm:$0xff]  ;;  %v2506_v26 = vpop.f32.mrb[12].mxu1  ;;  %v3210_v10 = vld [vmem:[#allocation20_spill] sm:$0xff] }
 0x307   : > { %v2488_v1 = vpop.eup %1835  ;;  %1855 = vpow2.f32 %v1158_v49  ;;  %3209 = vst [vmem:[#allocation9_spill] sm:$0xff] %v2506_v26  ;;  %v2517_v2 = vpop.f32.mrb[13].mxu1  ;;  %v1186_v26 = vmul.f32 1.442695, %v3213_v23  ;;  %v1194_v23 = vmul.f32 1.442695, %v3216_v8 }
 0x308   : > { %v2498_v55 = vpop.eup %1837  ;;  %1857 = vpow2.f32 %v2396_v56  ;;  %v1221_v38 = vadd.f32 %v2460_v61, %v1220_v30  ;;  %3212 = vst [vmem:[#allocation10_spill] sm:$0xff] %v2517_v2  ;;  %v2526_v58 = vpop.f32.mrb[14].mxu1  ;;  %v3215_v30 = vsub.f32 %v2278_v25, %v2320_v0  ;;  %v3218_v25 = vsub.f32 %v2290_v57, %v2320_v0 }
 0x309   : > { %v2508_v7 = vpop.eup %1839  ;;  %1859 = vpow2.f32 %v2398_v60  ;;  %3214 = vst [vmem:[#allocation11_spill] sm:$0xff] %v2526_v58 }
 0x30a   : > { %v2519_v49 = vpop.eup %1841  ;;  %1861 = vpow2.f32 %v2400_v11  ;;  %v1222_v60 = vadd.f32 %v2469_v22, %v1221_v38  ;;  %v1190_v56 = vmul.f32 1.442695, %v3215_v30  ;;  %v2541_v38 = vpop.f32.mrb[15].mxu1 }
 0x30b   : > { %v2528_v21 = vpop.eup %1843  ;;  %1863 = vpow2.f32 %v2402_v13  ;;  %3217 = vst [vmem:[#allocation12_spill] sm:$0xff] %v2541_v38  ;;  %v1198_v13 = vmul.f32 1.442695, %v3218_v25 }
 0x30c   : > { %v2534_v2 = vpop.eup %1845  ;;  %1865 = vpow2.f32 %v2404_v15  ;;  %v1223_v11 = vadd.f32 %v2479_v34, %v1222_v60  ;;  %v3220_v15 = vsub.f32 %v2296_v4, %v2320_v0  ;;  %v2555_v60 = vpop.f32.mrb[16].mxu1 }
 0x30d   : > { %v2543_v58 = vpop.eup %1847  ;;  %1867 = vpow2.f32 %v2406_v18  ;;  %3221 = vst [vmem:[#allocation14_spill] sm:$0xff] %v2555_v60  ;;  %v3223_v18 = vsub.f32 %v2302_v59, %v2320_v0 }
 0x30e   : > { %v2549_v30 = vpop.eup %1849  ;;  %1869 = vpow2.f32 %v1186_v26  ;;  %v1202_v41 = vmul.f32 1.442695, %v3220_v15  ;;  %v1224_v8 = vadd.f32 %v2488_v1, %v1223_v11  ;;  %v3225_v26 = vsub.f32 %v2308_v51, %v2320_v0  ;;  %v2568_v15 = vpop.f32.mrb[17].mxu1 }
 0x30f   : > { %3219 = vst [vmem:[#allocation13_spill] sm:$0xff] %v2549_v30  ;;  %v2557_v38 = vpop.eup %1851  ;;  %1871 = vpow2.f32 %v1190_v56  ;;  %v1206_v33 = vmul.f32 1.442695, %v3223_v18  ;;  %3226 = vst [vmem:[#allocation18_spill] sm:$0xff] %v2568_v15  ;;  %v3227_v56 = vsub.f32 %v2314_v43, %v2320_v0  ;;  %v3228_v51 = vsub.f32 %v2130_v12, %v2322_v52 }
 0x310   : > { %3222 = vst [vmem:[#allocation15_spill] sm:$0xff] %v2557_v38  ;;  %v2562_v57 = vpop.eup %1853  ;;  %1873 = vpow2.f32 %v1194_v23  ;;  %v1210_v25 = vmul.f32 1.442695, %v3225_v26  ;;  %v1225_v4 = vadd.f32 %v2498_v55, %v1224_v8  ;;  %v2581_v26 = vpop.f32.mrb[18].mxu1  ;;  %v3231_v43 = vsub.f32 %v2140_v17, %v2322_v52 }
 0x311   : > { %3224 = vst [vmem:[#allocation16_spill] sm:$0xff] %v2562_v57  ;;  %v2570_v11 = vpop.eup %1855  ;;  %1875 = vpow2.f32 %v1198_v13  ;;  %v1214_v60 = vmul.f32 1.442695, %v3227_v56  ;;  %v1092_v18 = vmul.f32 1.442695, %v3228_v51  ;;  %3229 = vst [vmem:[#allocation20_spill] sm:$0xff] %v2581_v26  ;;  %v3230_v13 = vsub.f32 %v2134_v14, %v2322_v52 }
 0x312   : > { %v2575_v59 = vpop.eup %1857  ;;  %1877 = vpow2.f32 %v1202_v41  ;;  %v1226_v23 = vadd.f32 %v2508_v7, %v1225_v4  ;;  %v1100_v0 = vmul.f32 1.442695, %v3231_v43  ;;  %v3232_v12 = vsub.f32 %v2148_v20, %v2322_v52  ;;  %v2600_v26 = vpop.f32.mrb[19].mxu1 }
 0x313   : > { %v2583_v8 = vpop.eup %1859  ;;  %1879 = vpow2.f32 %v1206_v33  ;;  %v1096_v15 = vmul.f32 1.442695, %v3230_v13  ;;  %v3233_v33 = vsub.f32 %v2155_v24, %v2322_v52  ;;  %3234 = vst [vmem:[#allocation21_spill] sm:$0xff] %v2600_v26  ;;  %v3235_v17 = vsub.f32 %v2161_v28, %v2322_v52  ;;  %v2622_v26 = vpop.f32.mrb[20].mxu1 }
 0x314   : > { %v2591_v41 = vpop.eup %1861  ;;  %1881 = vpow2.f32 %v1210_v25  ;;  %v1227_v4 = vadd.f32 %v2519_v49, %v1226_v23  ;;  %v1104_v56 = vmul.f32 1.442695, %v3232_v12  ;;  %v3236_v25 = vsub.f32 %v2167_v32, %v2322_v52 }
 0x315   : > { %v1108_v51 = vmul.f32 1.442695, %v3233_v33  ;;  %v2602_v14 = vpop.eup %1863  ;;  %1883 = vpow2.f32 %v1214_v60  ;;  %v1112_v13 = vmul.f32 1.442695, %v3235_v17  ;;  %v3237_v20 = vsub.f32 %v2173_v36, %v2322_v52 }
 0x316   : > { %v1116_v23 = vmul.f32 1.442695, %v3236_v25  ;;  %v2613_v12 = vpop.eup %1865  ;;  %v1228_v24 = vadd.f32 %v2528_v21, %v1227_v4  ;;  %1885 = vpow2.f32 %v1092_v18  ;;  %v3238_v60 = vsub.f32 %v2179_v40, %v2322_v52  ;;  %v2632_v40 = vpop.f32.mrb[21].mxu1 }
 0x317   : > { %v1120_v43 = vmul.f32 1.442695, %v3237_v20  ;;  %v3239_v28 = vsub.f32 %v2185_v44, %v2322_v52  ;;  %v2624_v32 = vpop.eup %1867  ;;  %1887 = vpow2.f32 %v1096_v15  ;;  %3240 = vst [vmem:[#allocation28_spill] sm:$0xff] %v2632_v40 }
 0x318   : > { %v1124_v33 = vmul.f32 1.442695, %v3238_v60  ;;  %v2634_v25 = vpop.eup %1869  ;;  %v1229_v44 = vadd.f32 %v2534_v2, %v1228_v24  ;;  %1889 = vpow2.f32 %v1100_v0  ;;  %v2641_v60 = vpop.f32.mrb[22].mxu1 }
 0x319   : > { %v1128_v17 = vmul.f32 1.442695, %v3239_v28  ;;  %3241 = vst [vmem:[#allocation29_spill] sm:$0xff] %v2641_v60  ;;  %v2643_v28 = vpop.eup %1871  ;;  %1891 = vpow2.f32 %v1104_v56  ;;  %v2651_v24 = vpop.f32.mrb[23].mxu1 }
 0x31a   : > { %3242 = vst [vmem:[#allocation30_spill] sm:$0xff] %v2651_v24  ;;  %v2653_v20 = vpop.eup %1873  ;;  %v1230_v15 = vadd.f32 %v2543_v58, %v1229_v44  ;;  %1893 = vpow2.f32 %v1108_v51  ;;  %v2660_v18 = vpop.f32.mrb[24].mxu1  ;;  %v3245_v24 = vsub.f32 %v2191_v48, %v2322_v52  ;;  %v3246_v51 = vsub.f32 %v3184_v39, %v2322_v52 }
 0x31b   : > { %3243 = vst [vmem:[#allocation31_spill] sm:$0xff] %v2660_v18  ;;  %v2662_v40 = vpop.eup %1875  ;;  %1895 = vpow2.f32 %v1112_v13  ;;  %v2664_v4 = vpop.f32.mrb[25].mxu1  ;;  %v3248_v48 = vsub.f32 %v3186_v45, %v2322_v52  ;;  %v3250_v39 = vsub.f32 %v3187_v6, %v2322_v52  ;;  %v3252_v45 = vsub.f32 %v3189_v47, %v2322_v52 }
 0x31c   : > { %3244 = vst [vmem:[#allocation32_spill] sm:$0xff] %v2664_v4  ;;  %v2672_v36 = vpop.eup %1877  ;;  %v1231_v56 = vadd.f32 %v2549_v30, %v1230_v15  ;;  %1897 = vpow2.f32 %v1116_v23  ;;  %v1132_v13 = vmul.f32 1.442695, %v3245_v24  ;;  %v2678_v18 = vpop.f32.mrb[26].mxu1  ;;  %v1136_v44 = vmul.f32 1.442695, %v3246_v51 }
 0x31d   : > { %v2682_v4 = vpop.eup %1879  ;;  %1899 = vpow2.f32 %v1120_v43  ;;  %v2687_v60 = vpop.f32.mrb[27].mxu1  ;;  %v1140_v24 = vmul.f32 1.442695, %v3248_v48  ;;  %v1144_v51 = vmul.f32 1.442695, %v3250_v39  ;;  %v3254_v6 = vsub.f32 %v3190_v3, %v2322_v52 }
 0x31e   : > { %3247 = vst [vmem:[#allocation33_spill] sm:$0xff] %v2687_v60  ;;  %v2689_v15 = vpop.eup %1881  ;;  %v1232_v23 = vadd.f32 %v2557_v38, %v1231_v56  ;;  %1901 = vpow2.f32 %v1124_v33  ;;  %v2695_v30 = vpop.f32.mrb[28].mxu1  ;;  %v1148_v48 = vmul.f32 1.442695, %v3252_v45  ;;  %v3258_v3 = vsub.f32 %v3194_v53, %v2322_v52 }
 0x31f   : > { %3249 = vst [vmem:[#allocation34_spill] sm:$0xff] %v2695_v30  ;;  %v2699_v0 = vpop.eup %1883  ;;  %1903 = vpow2.f32 %v1128_v17  ;;  %v2704_v60 = vpop.f32.mrb[29].mxu1  ;;  %v1152_v39 = vmul.f32 1.442695, %v3254_v6  ;;  %v3261_v53 = vpack.c.bf16 %v2430_v62, %v2420_v42 }
 0x320   : > { %3251 = vst [vmem:[#allocation35_spill] sm:$0xff] %v2704_v60  ;;  %v1886_v56 = vpop.eup %1885  ;;  %v1233_v33 = vadd.f32 %v2562_v57, %v1232_v23  ;;  %1905 = vpow2.f32 %v1132_v13  ;;  %v2710_v38 = vpop.f32.mrb[30].mxu1  ;;  %v3255_v60 = vsub.f32 %v3191_v54, %v2322_v52  ;;  %v1164_v6 = vmul.f32 1.442695, %v3258_v3 }
 0x321   : > { %3253 = vst [vmem:[#allocation36_spill] sm:$0xff] %v2710_v38  ;;  %v1888_v17 = vpop.eup %1887  ;;  %1907 = vpow2.f32 %v1136_v44  ;;  %v2720_v13 = vpop.f32.mrb[31].mxu1  ;;  %v3257_v44 = vsub.f32 %v3193_v9, %v2322_v52  ;;  %v3260_v9 = vsub.f32 %v3197_v31, %v2322_v52 }
 0x322   : > { %v1156_v23 = vmul.f32 1.442695, %v3255_v60  ;;  %3256 = vst [vmem:[#allocation37_spill] sm:$0xff] %v2720_v13  ;;  %v1890_v57 = vpop.eup %1889  ;;  %v1234_v47 = vadd.f32 %v2570_v11, %v1233_v33  ;;  %1909 = vpow2.f32 %v1140_v24  ;;  %v1255_v45 = vadd.f32 %v1888_v17, %v1886_v56 }
 0x323   : > { %v1343_v38 = vpack.c.bf16 %v1888_v17, %v1886_v56  ;;  %v1892_v30 = vpop.eup %1891  ;;  %1911 = vpow2.f32 %v1144_v51  ;;  %v1160_v43 = vmul.f32 1.442695, %v3257_v44  ;;  %v3259_v51 = vsub.f32 %v3196_v50, %v2322_v52 }
 0x324   : > { %v1894_v54 = vpop.eup %1893  ;;  %v1235_v60 = vadd.f32 %v2575_v59, %v1234_v47  ;;  %1913 = vpow2.f32 %v1148_v48  ;;  %v1256_v13 = vadd.f32 %v1890_v57, %v1255_v45  ;;  %v1345_v33 = vpack.c.bf16 %v1892_v30, %v1890_v57 }
 0x325   : > { %1406 = vmatprep.subr.bf16.mxu1 %v1343_v38  ;;  %v1896_v24 = vpop.eup %1895  ;;  %1915 = vpow2.f32 %v1152_v39  ;;  %v1168_v56 = vmul.f32 1.442695, %v3259_v51  ;;  %v1172_v17 = vmul.f32 1.442695, %v3260_v9  ;;  %v3262_v50 = vsub.f32 %v3198_v27, %v2322_v52  ;;  %v3267_v9 = vld [vmem:[#allocation17_spill] sm:$0xff] }
 0x326   : > { %1407 = vmatpush1.bf16.xpose.msra.mxu1 %v3261_v53  ;;  %v2739_v44 = vpop.eup %1897  ;;  %v1236_v48 = vadd.f32 %v2583_v8, %v1235_v60  ;;  %1917 = vpow2.f32 %v1156_v23  ;;  %v1257_v38 = vadd.f32 %v1892_v30, %v1256_v13  ;;  %v1347_v57 = vpack.c.bf16 %v1896_v24, %v1894_v54 }
 0x327   : > { %1408 = vmatprep.subr.bf16.mxu1 %v1345_v33  ;;  %v2742_v39 = vpop.eup %1899  ;;  %1919 = vpow2.f32 %v1160_v43  ;;  %v1176_v31 = vmul.f32 1.442695, %v3262_v50  ;;  %v3263_v47 = vsub.f32 %v3200_v46, %v2322_v52  ;;  %v3264_v27 = vsub.f32 %v3201_v35, %v2322_v52 }
 0x328   : > { %v2750_v62 = vpop.eup %1901  ;;  %v1237_v45 = vadd.f32 %v2591_v41, %v1236_v48  ;;  %1921 = vpow2.f32 %v1164_v6  ;;  %v1258_v23 = vadd.f32 %v1894_v54, %v1257_v38  ;;  %v1349_v30 = vpack.c.bf16 %v2742_v39, %v2739_v44 }
 0x329   : > { %v1180_v42 = vmul.f32 1.442695, %v3263_v47  ;;  %v2755_v13 = vpop.eup %1903  ;;  %1923 = vpow2.f32 %v1168_v56  ;;  %v1184_v43 = vmul.f32 1.442695, %v3264_v27  ;;  %v3265_v46 = vsub.f32 %v3203_v37, %v2322_v52  ;;  %v3270_v47 = vld [vmem:[#allocation19_spill] sm:$0xff] }
 0x32a   : > { %v2763_v60 = vpop.eup %1905  ;;  %v1238_v33 = vadd.f32 %v2602_v14, %v1237_v45  ;;  %1925 = vpow2.f32 %v1172_v17  ;;  %v1259_v6 = vadd.f32 %v1896_v24, %v1258_v23  ;;  %v1351_v54 = vpack.c.bf16 %v2755_v13, %v2750_v62 }
 0x32b   : > { %v1188_v3 = vmul.f32 1.442695, %v3265_v46  ;;  %v2768_v51 = vpop.eup %1907  ;;  %1927 = vpow2.f32 %v1176_v31  ;;  %v3266_v35 = vsub.f32 %v3204_v16, %v2322_v52  ;;  %v3268_v37 = vsub.f32 %v3267_v9, %v2322_v52 }
 0x32c   : > { %v2776_v48 = vpop.eup %1909  ;;  %v1239_v38 = vadd.f32 %v2613_v12, %v1238_v33  ;;  %1929 = vpow2.f32 %v1180_v42  ;;  %v1260_v24 = vadd.f32 %v2739_v44, %v1259_v6  ;;  %v1353_v17 = vpack.c.bf16 %v2768_v51, %v2763_v60 }
 0x32d   : > { %v1192_v56 = vmul.f32 1.442695, %v3266_v35  ;;  %v1196_v53 = vmul.f32 1.442695, %v3268_v37  ;;  %v2782_v50 = vpop.eup %1911  ;;  %1931 = vpow2.f32 %v1184_v43  ;;  %v3269_v16 = vsub.f32 %v3207_v19, %v2322_v52 }
 0x32e   : > { %v3271_v45 = vsub.f32 %v3270_v47, %v2322_v52  ;;  %v3272_v27 = vpack.c.bf16 %v2450_v29, %v2440_v63  ;;  %v2793_v42 = vpop.eup %1913  ;;  %v1240_v44 = vadd.f32 %v2624_v32, %v1239_v38  ;;  %1933 = vpow2.f32 %v1188_v3 }
 0x32f   : > { %v1200_v31 = vmul.f32 1.442695, %v3269_v16  ;;  %v1261_v46 = vadd.f32 %v2742_v39, %v1260_v24  ;;  %v1355_v19 = vpack.c.bf16 %v2782_v50, %v2776_v48  ;;  %v2799_v43 = vpop.eup %1915  ;;  %1935 = vpow2.f32 %v1192_v56  ;;  %v3275_v56 = vld [vmem:[#allocation22_spill] sm:$0xff] }
 0x330   : > { %v1204_v23 = vmul.f32 1.442695, %v3271_v45  ;;  %1409 = vmatpush1.bf16.xpose.msra.mxu1 %v3272_v27  ;;  %v3273_v33 = vsub.f32 %v3210_v10, %v2322_v52  ;;  %v3274_v63 = vsub.f32 %v3211_v5, %v2322_v52  ;;  %v2807_v35 = vpop.eup %1917  ;;  %v1241_v3 = vadd.f32 %v2634_v25, %v1240_v44 }
 0x331   : > { %1410 = vmatprep.subr.bf16.mxu1 %v1347_v57  ;;  %1937 = vpow2.f32 %v1196_v53  ;;  %v1262_v57 = vadd.f32 %v2750_v62, %v1261_v46  ;;  %v1357_v39 = vpack.c.bf16 %v2799_v43, %v2793_v42  ;;  %v2813_v9 = vpop.eup %1919  ;;  %v3276_v10 = vsub.f32 %v3275_v56, %v2322_v52 }
 0x332   : > { %v1208_v6 = vmul.f32 1.442695, %v3273_v33  ;;  %v1212_v29 = vmul.f32 1.442695, %v3274_v63  ;;  %1939 = vpow2.f32 %v1200_v31  ;;  %v2818_v38 = vpop.eup %1921  ;;  %v1242_v5 = vadd.f32 %v2643_v28, %v1241_v3 }
 0x333   : > { %v1216_v37 = vmul.f32 1.442695, %v3276_v10  ;;  %1941 = vpow2.f32 %v1204_v23  ;;  %v1263_v24 = vadd.f32 %v2755_v13, %v1262_v57  ;;  %v1359_v53 = vpack.c.bf16 %v2813_v9, %v2807_v35  ;;  %v2824_v16 = vpop.eup %1923 }
 0x334   : > { %1943 = vpow2.f32 %v1208_v6  ;;  %v2826_v47 = vpop.eup %1925  ;;  %v1243_v31 = vadd.f32 %v2653_v20, %v1242_v5  ;;  %v1361_v45 = vpack.c.bf16 %v2824_v16, %v2818_v38  ;;  %v3277_v23 = vpack.c.bf16 %v2469_v22, %v2460_v61 }
 0x335   : > { %1945 = vpow2.f32 %v1212_v29  ;;  %v1264_v52 = vadd.f32 %v2763_v60, %v1263_v24  ;;  %v2832_v27 = vpop.eup %1927  ;;  %v3279_v62 = vpack.c.bf16 %v2508_v7, %v2498_v55  ;;  %v3280_v7 = vpack.c.bf16 %v2528_v21, %v2519_v49  ;;  %v3282_v49 = vld [vmem:[#allocation23_spill] sm:$0xff] }
 0x336   : > { %1947 = vpow2.f32 %v1216_v37  ;;  %v2837_v44 = vpop.eup %1929  ;;  %v1244_v46 = vadd.f32 %v2662_v40, %v1243_v31  ;;  %v1363_v6 = vpack.c.bf16 %v2832_v27, %v2826_v47 }
 0x337   : > { %v1265_v33 = vadd.f32 %v2768_v51, %v1264_v52  ;;  %v2843_v63 = vpop.eup %1931 }
 0x338   : > { %1411 = vmatpush1.bf16.xpose.msra.mxu1 %v3277_v23  ;;  %v2845_v29 = vpop.eup %1933  ;;  %v1245_v3 = vadd.f32 %v2672_v36, %v1244_v46 }
 0x339   : > { %1412 = vmatprep.subr.bf16.mxu1 %v1349_v30  ;;  %v1266_v57 = vadd.f32 %v2776_v48, %v1265_v33  ;;  %v2851_v61 = vpop.eup %1935  ;;  %v3278_v33 = vpack.c.bf16 %v2488_v1, %v2479_v34 }
 0x33a   : > { %v1246_v30 = vadd.f32 %v2682_v4, %v1245_v3 }
 0x33b   : > { %v2853_v56 = vpop.eup %1937  ;;  %v1267_v10 = vadd.f32 %v2782_v50, %v1266_v57  ;;  %v3283_v50 = vld [vmem:[#allocation25_spill] sm:$0xff] }
 0x33c   : > { %v2859_v5 = vpop.eup %1939  ;;  %v1247_v31 = vadd.f32 %v2689_v15, %v1246_v30 }
 0x33d   : > { %v2861_v24 = vpop.eup %1941  ;;  %v1268_v52 = vadd.f32 %v2793_v42, %v1267_v10 }
 0x33e   : > { %v2867_v46 = vpop.eup %1943  ;;  %v1248_v57 = vadd.f32 %v2699_v0, %v1247_v31 }
 0x33f   : > { %v2872_v3 = vpop.eup %1945  ;;  %v1269_v37 = vadd.f32 %v2799_v43, %v1268_v52  ;;  %v1371_v30 = vpack.c.bf16 %v2867_v46, %v2861_v24  ;;  %v3288_v43 = vld [vmem:[#allocation9_spill] sm:$0xff] }
 0x340   : > { %1413 = vmatpush1.bf16.xpose.msra.mxu1 %v3278_v33  ;;  %v2881_v10 = vpop.eup %1947  ;;  %v1249_v23 = vrot.slane %v1248_v57, 4 }
 0x341   : > { %1414 = vmatprep.subr.bf16.mxu1 %v1351_v54  ;;  %v1270_v22 = vadd.f32 %v2807_v35, %v1269_v37  ;;  %v3301_v35 = vpack.c.bf16 %v2583_v8, %v2575_v59  ;;  %v3307_v8 = vld [vmem:[#allocation4_spill] sm:$0xff] }
 0x342   : > { %v1250_v34 = vadd.f32 %v1249_v23, %v1248_v57 }
 0x343   : > { %v1271_v31 = vadd.f32 %v2813_v9, %v1270_v22 }
 0x344   : > { %v1251_v33 = vrot.slane %v1250_v34, 2 }
 0x345   : > { %v1272_v52 = vadd.f32 %v2818_v38, %v1271_v31  ;;  %v3284_v31 = vld [vmem:[#allocation27_spill] sm:$0xff]  ;;  %v3303_v38 = vpack.c.bf16 %v2843_v63, %v2837_v44 }
 0x346   : > { %v1252_v13 = vadd.f32 %v1251_v33, %v1250_v34 }
 0x347   : > { %v1273_v54 = vadd.f32 %v2824_v16, %v1272_v52  ;;  %v3285_v52 = vld [vmem:[#allocation3_spill] sm:$0xff] }
 0x348   : > { %1415 = vmatpush1.bf16.xpose.msra.mxu1 %v3279_v62  ;;  %v1253_v37 = vrot.slane %v1252_v13, 1 }
 0x349   : > { %1416 = vmatprep.subr.bf16.mxu1 %v1353_v17  ;;  %v1274_v1 = vadd.f32 %v2826_v47, %v1273_v54  ;;  %v3287_v54 = vld [vmem:[#allocation7_spill] sm:$0xff] }
 0x34a   : > { %v1254_v23 = vadd.f32 %v1253_v37, %v1252_v13 }
 0x34b   : > { %v1275_v22 = vadd.f32 %v2832_v27, %v1274_v1  ;;  %v3281_v1 = vpack.c.bf16 %v2543_v58, %v2534_v2  ;;  %v3286_v2 = vld [vmem:[#allocation5_spill] sm:$0xff]  ;;  %v3309_v27 = vld [vmem:[#allocation8_spill] sm:$0xff] }
 0x34c   : > { %1949 = vrcp.f32 %v1254_v23 }
 0x34d   : > { %v1276_v57 = vadd.f32 %v2837_v44, %v1275_v22  ;;  %v3289_v22 = vld [vmem:[#allocation11_spill] sm:$0xff]  ;;  %v3312_v44 = vld [vmem:[#allocation18_spill] sm:$0xff] }
 0x34f   : > { %v1277_v55 = vadd.f32 %v2843_v63, %v1276_v57 }
 0x350   : > { %1417 = vmatpush1.bf16.xpose.msra.mxu1 %v3280_v7  ;;  %v3290_v7 = vld [vmem:[#allocation14_spill] sm:$0xff] }
 0x351   : > { %1418 = vmatprep.subr.bf16.mxu1 %v1355_v19  ;;  %v1278_v60 = vadd.f32 %v2845_v29, %v1277_v55 }
 0x353   : > { %v1279_v51 = vadd.f32 %v2851_v61, %v1278_v60 }
 0x355   : > { %v1280_v17 = vadd.f32 %v2853_v56, %v1279_v51 }
 0x356   : > { %v1950_v34 = vpop.eup %1949 }
 0x357   : > { %v1281_v21 = vadd.f32 %v2859_v5, %v1280_v17  ;;  %v2916_v48 = vmul.f32 %v1950_v34, %v3282_v49  ;;  %v2919_v19 = vmul.f32 %v1950_v34, %v3283_v50  ;;  %v2922_v33 = vmul.f32 %v1950_v34, %v3284_v31  ;;  %v3291_v17 = vld [vmem:[#allocation20_spill] sm:$0xff]  ;;  %v3292_v50 = vld [vmem:[#allocation29_spill] sm:$0xff]  ;;  %v3296_v49 = vld [vmem:[#allocation15_spill] sm:$0xff] }
 0x358   : > { %1419 = vmatpush1.bf16.xpose.msra.mxu1 %v3281_v1  ;;  %v2925_v62 = vmul.f32 %v1950_v34, %v3285_v52  ;;  %v2929_v13 = vmul.f32 %v1950_v34, %v3286_v2  ;;  %v2932_v42 = vmul.f32 %v1950_v34, %v3287_v54  ;;  %v2942_v57 = vmul.f32 %v1950_v34, %v3289_v22  ;;  %v3293_v52 = vld [vmem:[#allocation31_spill] sm:$0xff]  ;;  %v3294_v22 = vld [vmem:[#allocation34_spill] sm:$0xff] }
 0x359   : > { %1420 = vmatprep.subr.bf16.mxu1 %v1357_v39  ;;  %v1282_v58 = vadd.f32 %v2861_v24, %v1281_v21  ;;  %v2935_v39 = vmul.f32 %v1950_v34, %v3288_v43  ;;  %v1326_v37 = vpack.c.bf16 %v2919_v19, %v2916_v48  ;;  %v2945_v55 = vmul.f32 %v1950_v34, %v3290_v7  ;;  %v3295_v7 = vld [vmem:[#allocation36_spill] sm:$0xff] }
 0x35a   : > { %v1328_v23 = vpack.c.bf16 %v2925_v62, %v2922_v33  ;;  %v2951_v1 = vmul.f32 %v1950_v34, %v3291_v17  ;;  %v2954_v21 = vmul.f32 %v1950_v34, %v2622_v26  ;;  %v2959_v31 = vmul.f32 %v1950_v34, %v3292_v50  ;;  %v3297_v50 = vld [vmem:[#allocation13_spill] sm:$0xff]  ;;  %v1955_v62 = vld [vmem:[%s2016_s17 + $0x10] sm:$0xff] }
 0x35b   : > { %v1283_v60 = vadd.f32 %v2867_v46, %v1282_v58  ;;  %v2962_v2 = vmul.f32 %v1950_v34, %v3293_v52  ;;  %v2965_v58 = vmul.f32 %v1950_v34, %v2678_v18  ;;  %v2971_v26 = vmul.f32 %v1950_v34, %v3294_v22 }
 0x35c   : > { %v2974_v17 = vmul.f32 %v1950_v34, %v3295_v7  ;;  %v3298_v51 = vpack.c.bf16 %v3296_v49, %v3297_v50  ;;  %v1336_v52 = vpack.c.bf16 %v2959_v31, %v2954_v21  ;;  %v3308_v50 = vld [vmem:[#allocation6_spill] sm:$0xff] }
 0x35d   : > { %v1284_v54 = vadd.f32 %v2872_v3, %v1283_v60 }
 0x35e   : > { %v1340_v34 = vpack.c.bf16 %v2974_v17, %v2971_v26  ;;  %v3306_v26 = vld [vmem:[#allocation2_spill] sm:$0xff] }
 0x35f   : > { %v1285_v60 = vadd.f32 %v2881_v10, %v1284_v54 }
 0x360   : > { %1421 = vmatpush1.bf16.xpose.msra.mxu1 %v3298_v51  ;;  %v3299_v51 = vld [vmem:[#allocation16_spill] sm:$0xff] }
 0x361   : > { %1422 = vmatprep.subr.bf16.mxu1 %v1359_v53  ;;  %v1286_v22 = vrot.slane %v1285_v60, 4  ;;  %v3300_v49 = vpack.c.bf16 %v2570_v11, %v3299_v51  ;;  %v3302_v11 = vpack.c.bf16 %v2602_v14, %v2591_v41  ;;  %v3304_v53 = vld [vmem:[#allocation24_spill] sm:$0xff] }
 0x362   : > { %v3311_v14 = vld [vmem:[#allocation12_spill] sm:$0xff] }
 0x363   : > { %v1287_v7 = vadd.f32 %v1286_v22, %v1285_v60  ;;  %v3310_v60 = vld [vmem:[#allocation10_spill] sm:$0xff] }
 0x365   : > { %v1288_v43 = vrot.slane %v1287_v7, 2 }
 0x367   : > { %v1289_v21 = vadd.f32 %v1288_v43, %v1287_v7 }
 0x368   : > { %1423 = vmatpush1.bf16.xpose.msra.mxu1 %v3300_v49  ;;  %v3313_v49 = vld [vmem:[#allocation21_spill] sm:$0xff] }
 0x369   : > { %1424 = vmatprep.subr.bf16.mxu1 %v1361_v45  ;;  %v1290_v31 = vrot.slane %v1289_v21, 1  ;;  %v3305_v45 = vld [vmem:[#allocation26_spill] sm:$0xff] }
 0x36b   : > { %v1291_v54 = vadd.f32 %v1290_v31, %v1289_v21 }
 0x36d   : > { %1951 = vrcp.f32 %v1291_v54 }
 0x370   : > { %1425 = vmatpush1.bf16.xpose.msra.mxu1 %v3301_v35  ;;  %v3314_v35 = vld [vmem:[#allocation28_spill] sm:$0xff] }
 0x371   : > { %1426 = vmatprep.subr.bf16.mxu1 %v1363_v6 }
 0x377   : > { %v1952_v9 = vpop.eup %1951 }
 0x378   : > { %1427 = vmatpush1.bf16.xpose.msra.mxu1 %v3302_v11  ;;  %v1295_v16 = vmul.f32 %v1952_v9, %v3304_v53  ;;  %v1297_v43 = vmul.f32 %v1952_v9, %v3305_v45  ;;  %v1299_v59 = vmul.f32 %v1952_v9, %v3306_v26  ;;  %v1301_v17 = vmul.f32 %v1952_v9, %v3307_v8  ;;  %v3316_v26 = vld [vmem:[#allocation32_spill] sm:$0xff] }
 0x379   : > { %1428 = vmatprep.subr.bf16.mxu1 %v3303_v38  ;;  %v1303_v47 = vmul.f32 %v1952_v9, %v3308_v50  ;;  %v1305_v6 = vmul.f32 %v1952_v9, %v3309_v27  ;;  %v1307_v41 = vmul.f32 %v1952_v9, %v3310_v60  ;;  %v1309_v22 = vmul.f32 %v1952_v9, %v3311_v14  ;;  %v3315_v38 = vld [vmem:[#allocation30_spill] sm:$0xff]  ;;  %v3317_v50 = vld [vmem:[#allocation33_spill] sm:$0xff]  ;;  %v3318_v60 = vld [vmem:[#allocation35_spill] sm:$0xff] }
 0x37a   : > { %v1327_v7 = vpack.c.bf16 %v1297_v43, %v1295_v16  ;;  %v1329_v51 = vpack.c.bf16 %v1301_v17, %v1299_v59  ;;  %v1311_v63 = vmul.f32 %v1952_v9, %v3312_v44  ;;  %v1313_v21 = vmul.f32 %v1952_v9, %v3313_v49  ;;  %v3319_v43 = vld [vmem:[#allocation37_spill] sm:$0xff]  ;;  %v1957_v44 = vld [vmem:[%s2016_s17 + $0x20] sm:$0xff] }
 0x37b   : > { %v1331_v31 = vpack.c.bf16 %v1305_v6, %v1303_v47  ;;  %v1333_v54 = vpack.c.bf16 %v1309_v22, %v1307_v41  ;;  %v1315_v11 = vmul.f32 %v1952_v9, %v3314_v35  ;;  %v1317_v53 = vmul.f32 %v1952_v9, %v3315_v38 }
 0x37c   : > { %v1335_v45 = vpack.c.bf16 %v1313_v21, %v1311_v63  ;;  %v1319_v8 = vmul.f32 %v1952_v9, %v3316_v26  ;;  %v1321_v27 = vmul.f32 %v1952_v9, %v3317_v50  ;;  %v1323_v18 = vmul.f32 %v1952_v9, %v3318_v60  ;;  %1438 = vmatprep.mubr.bf16.mxu1 %v1327_v7 }
 0x37d   : > { %v1337_v16 = vpack.c.bf16 %v1317_v53, %v1315_v11  ;;  %v1325_v59 = vmul.f32 %v1952_v9, %v3319_v43  ;;  %v3320_v47 = vpack.c.bf16 %v2624_v32, %v2613_v12  ;;  %v3321_v41 = vpack.c.bf16 %v2851_v61, %v2845_v29  ;;  %v1954_v29 = vld [vmem:[%s2016_s17 + $0x8] sm:$0xff] }
 0x37e   : > { %v1339_v17 = vpack.c.bf16 %v1321_v27, %v1319_v8  ;;  %v3322_v14 = vpack.c.bf16 %v2643_v28, %v2634_v25  ;;  %v3323_v22 = vpack.c.bf16 %v2859_v5, %v2853_v56  ;;  %v3324_v9 = vpack.c.bf16 %v2662_v40, %v2653_v20  ;;  %v1953_v28 = vld [vmem:[%s2016_s17] sm:$0xff] }
 0x37f   : > { %v1341_v6 = vpack.c.bf16 %v1325_v59, %v1323_v18  ;;  %v3325_v12 = vpack.c.bf16 %v2682_v4, %v2672_v36  ;;  %v3326_v32 = vpack.c.bf16 %v2881_v10, %v2872_v3  ;;  %v3327_v25 = vpack.c.bf16 %v2699_v0, %v2689_v15 }
 0x380   : > { %1429 = vmatpush1.bf16.xpose.msra.mxu1 %v3320_v47  ;;  %v3328_v36 = vpack.c.bf16 %v2932_v42, %v2929_v13  ;;  %v3329_v4 = vpack.c.bf16 %v2942_v57, %v2935_v39  ;;  %v3330_v40 = vpack.c.bf16 %v2951_v1, %v2945_v55  ;;  %v3331_v20 = vpack.c.bf16 %v2965_v58, %v2962_v2  ;;  %v1960_v47 = vld [vmem:[%s2016_s17 + $0x38] sm:$0xff] }
 0x381   : > { %1430 = vmatprep.subr.bf16.mxu1 %v3321_v41  ;;  %v1374_v0 = vunpack.c.l.bf16 %v1953_v28  ;;  %v1375_v15 = vunpack.c.h.bf16 %v1953_v28  ;;  %v1376_v61 = vunpack.c.l.bf16 %v1954_v29  ;;  %v1377_v5 = vunpack.c.h.bf16 %v1954_v29  ;;  %v1962_v29 = vld [vmem:[%s2016_s17 + $0x48] sm:$0xff] }
 0x382   : > { %v1378_v13 = vunpack.c.l.bf16 %v1955_v62  ;;  %v1379_v39 = vunpack.c.h.bf16 %v1955_v62  ;;  %v1382_v63 = vunpack.c.l.bf16 %v1957_v44  ;;  %v1383_v21 = vunpack.c.h.bf16 %v1957_v44  ;;  %v1963_v62 = vld [vmem:[%s2016_s17 + $0x50] sm:$0xff]  ;;  %v1965_v44 = vld [vmem:[%s2016_s17 + $0x60] sm:$0xff] }
 0x388   : > { %1431 = vmatpush1.bf16.xpose.msra.mxu1 %v3322_v14  ;;  %v1389_v14 = vunpack.c.h.bf16 %v1960_v47 }
 0x389   : > { %1432 = vmatprep.subr.bf16.mxu1 %v3323_v22 }
 0x390   : > { %1433 = vmatpush1.bf16.xpose.msra.mxu1 %v3324_v9 }
 0x391   : > { %1434 = vmatprep.subr.bf16.mxu1 %v1371_v30 }
 0x398   : > { %1435 = vmatpush1.bf16.xpose.msra.mxu1 %v3325_v12 }
 0x399   : > { %1436 = vmatprep.subr.bf16.mxu1 %v3326_v32 }
 0x3a0   : > { %1437 = vmatpush1.bf16.xpose.msra.mxu1 %v3327_v25 }
 0x3a7   : > { %1439 = vmatmul.mubr.bf16.vlgmr.msra.gmra.mrb[32].mxu1 %v1326_v37  ;;  %v1956_v37 = vld [vmem:[%s2016_s17 + $0x18] sm:$0xff] }
 0x3a8   : > { %1448 = vmatprep.mubr.bf16.mxu1 %v1329_v51  ;;  %v1381_v55 = vunpack.c.h.bf16 %v1956_v37 }
 0x3af   : > { %1449 = vmatmul.mubr.bf16.gmra.mrb[36].mxu1 %v1328_v23  ;;  %v1380_v23 = vunpack.c.l.bf16 %v1956_v37  ;;  %v1964_v37 = vld [vmem:[%s2016_s17 + $0x58] sm:$0xff] }
 0x3b0   : > { %1458 = vmatprep.mubr.bf16.mxu1 %v1331_v31  ;;  %v1958_v31 = vld [vmem:[%s2016_s17 + $0x28] sm:$0xff] }
 0x3b1   : > { %v1385_v11 = vunpack.c.h.bf16 %v1958_v31 }
 0x3b7   : > { %1459 = vmatmul.mubr.bf16.gmra.mrb[40].mxu1 %v3328_v36 }
 0x3b8   : > { %1468 = vmatprep.mubr.bf16.mxu1 %v1333_v54  ;;  %v1384_v54 = vunpack.c.l.bf16 %v1958_v31  ;;  %v1966_v31 = vld [vmem:[%s2016_s17 + $0x68] sm:$0xff] }
 0x3bf   : > { %1469 = vmatmul.mubr.bf16.gmra.mrb[44].mxu1 %v3329_v4 }
 0x3c0   : > { %1478 = vmatprep.mubr.bf16.mxu1 %v1335_v45 }
 0x3c7   : > { %1479 = vmatmul.mubr.bf16.gmra.mrb[48].mxu1 %v3330_v40 }
 0x3c8   : > { %1488 = vmatprep.mubr.bf16.mxu1 %v1337_v16  ;;  %v1959_v16 = vld [vmem:[%s2016_s17 + $0x30] sm:$0xff] }
 0x3c9   : > { %v1386_v43 = vunpack.c.l.bf16 %v1959_v16 }
 0x3cf   : > { %1489 = vmatmul.mubr.bf16.gmra.mrb[52].mxu1 %v1336_v52 }
 0x3d0   : > { %1498 = vmatprep.mubr.bf16.mxu1 %v1339_v17  ;;  %v1387_v17 = vunpack.c.h.bf16 %v1959_v16  ;;  %v1967_v16 = vld [vmem:[%s2016_s17 + $0x70] sm:$0xff] }
 0x3d7   : > { %1499 = vmatmul.mubr.bf16.gmra.mrb[56].mxu1 %v3331_v20  ;;  %v1961_v20 = vld [vmem:[%s2016_s17 + $0x40] sm:$0xff] }
 0x3d8   : > { %1508 = vmatprep.mubr.bf16.mxu1 %v1341_v6  ;;  %v1388_v6 = vunpack.c.l.bf16 %v1960_v47  ;;  %v1390_v28 = vunpack.c.l.bf16 %v1961_v20  ;;  %v1968_v47 = vld [vmem:[%s2016_s17 + $0x78] sm:$0xff] }
 0x3df   : > { %1509 = vmatmul.mubr.bf16.gmra.mrb[60].mxu1 %v1340_v34 }
 0x47a   : > { %v1440_v56 = vpop.f32.mrb[32].mxu1 }
 0x47b   : > { %v1441_v24 = vadd.f32 %v1440_v56, %v1374_v0  ;;  %v1442_v46 = vpop.f32.mrb[33].mxu1 }
 0x47c   : > { %v1443_v3 = vadd.f32 %v1442_v46, %v1375_v15  ;;  %v1444_v30 = vpop.f32.mrb[34].mxu1  ;;  %v1391_v15 = vunpack.c.h.bf16 %v1961_v20 }
 0x47d   : > { %v1445_v10 = vadd.f32 %v1444_v30, %v1376_v61  ;;  %v1446_v48 = vpop.f32.mrb[35].mxu1  ;;  %v1392_v61 = vunpack.c.l.bf16 %v1962_v29 }
 0x47e   : > { %v1763_v19 = vpack.c.bf16 %v1443_v3, %v1441_v24  ;;  %v1447_v33 = vadd.f32 %v1446_v48, %v1377_v5  ;;  %v1393_v5 = vunpack.c.h.bf16 %v1962_v29 }
 0x480   : > { %1615 = vst [vmem:[%s3075_s29] sm:$0xff] %v1763_v19  ;;  %v1764_v42 = vpack.c.bf16 %v1447_v33, %v1445_v10 }
 0x482   : > { %1616 = vst [vmem:[%s3075_s29 + $0x8] sm:$0xff] %v1764_v42  ;;  %v1450_v57 = vpop.f32.mrb[36].mxu1 }
 0x483   : > { %v1451_v1 = vadd.f32 %v1450_v57, %v1378_v13  ;;  %v1452_v2 = vpop.f32.mrb[37].mxu1  ;;  %v1394_v13 = vunpack.c.l.bf16 %v1963_v62 }
 0x484   : > { %v1453_v58 = vadd.f32 %v1452_v2, %v1379_v39  ;;  %v1454_v52 = vpop.f32.mrb[38].mxu1  ;;  %v1395_v39 = vunpack.c.h.bf16 %v1963_v62 }
 0x485   : > { %v1455_v18 = vadd.f32 %v1454_v52, %v1380_v23  ;;  %v1456_v34 = vpop.f32.mrb[39].mxu1  ;;  %v1396_v23 = vunpack.c.l.bf16 %v1964_v37 }
 0x486   : > { %v1765_v7 = vpack.c.bf16 %v1453_v58, %v1451_v1  ;;  %v1457_v51 = vadd.f32 %v1456_v34, %v1381_v55  ;;  %v1397_v55 = vunpack.c.h.bf16 %v1964_v37 }
 0x488   : > { %1617 = vst [vmem:[%s3075_s29 + $0x10] sm:$0xff] %v1765_v7  ;;  %v1766_v49 = vpack.c.bf16 %v1457_v51, %v1455_v18 }
 0x48a   : > { %1618 = vst [vmem:[%s3075_s29 + $0x18] sm:$0xff] %v1766_v49  ;;  %v1460_v35 = vpop.f32.mrb[40].mxu1 }
 0x48b   : > { %v1461_v38 = vadd.f32 %v1460_v35, %v1382_v63  ;;  %v1462_v53 = vpop.f32.mrb[41].mxu1  ;;  %v1398_v63 = vunpack.c.l.bf16 %v1965_v44 }
 0x48c   : > { %v1463_v45 = vadd.f32 %v1462_v53, %v1383_v21  ;;  %v1464_v26 = vpop.f32.mrb[42].mxu1  ;;  %v1399_v21 = vunpack.c.h.bf16 %v1965_v44 }
 0x48d   : > { %v1465_v8 = vadd.f32 %v1464_v26, %v1384_v54  ;;  %v1466_v50 = vpop.f32.mrb[43].mxu1  ;;  %v1400_v54 = vunpack.c.l.bf16 %v1966_v31 }
 0x48e   : > { %v1767_v27 = vpack.c.bf16 %v1463_v45, %v1461_v38  ;;  %v1467_v60 = vadd.f32 %v1466_v50, %v1385_v11  ;;  %v1401_v11 = vunpack.c.h.bf16 %v1966_v31 }
 0x490   : > { %1619 = vst [vmem:[%s3075_s29 + $0x20] sm:$0xff] %v1767_v27  ;;  %v1768_v59 = vpack.c.bf16 %v1467_v60, %v1465_v8 }
 0x492   : > { %1620 = vst [vmem:[%s3075_s29 + $0x28] sm:$0xff] %v1768_v59  ;;  %v1470_v41 = vpop.f32.mrb[44].mxu1 }
 0x493   : > { %v1471_v22 = vadd.f32 %v1470_v41, %v1386_v43  ;;  %v1472_v9 = vpop.f32.mrb[45].mxu1  ;;  %v1402_v43 = vunpack.c.l.bf16 %v1967_v16 }
 0x494   : > { %v1473_v12 = vadd.f32 %v1472_v9, %v1387_v17  ;;  %v1474_v32 = vpop.f32.mrb[46].mxu1  ;;  %v1403_v17 = vunpack.c.h.bf16 %v1967_v16 }
 0x495   : > { %v1475_v25 = vadd.f32 %v1474_v32, %v1388_v6  ;;  %v1476_v36 = vpop.f32.mrb[47].mxu1  ;;  %v1404_v6 = vunpack.c.l.bf16 %v1968_v47 }
 0x496   : > { %v1769_v4 = vpack.c.bf16 %v1473_v12, %v1471_v22  ;;  %v1477_v40 = vadd.f32 %v1476_v36, %v1389_v14  ;;  %v1405_v14 = vunpack.c.h.bf16 %v1968_v47 }
 0x498   : > { %1621 = vst [vmem:[%s3075_s29 + $0x30] sm:$0xff] %v1769_v4  ;;  %v1770_v0 = vpack.c.bf16 %v1477_v40, %v1475_v25 }
 0x49a   : > { %1622 = vst [vmem:[%s3075_s29 + $0x38] sm:$0xff] %v1770_v0  ;;  %v1480_v56 = vpop.f32.mrb[48].mxu1 }
 0x49b   : > { %v1481_v24 = vadd.f32 %v1480_v56, %v1390_v28  ;;  %v1482_v46 = vpop.f32.mrb[49].mxu1 }
 0x49c   : > { %v1483_v3 = vadd.f32 %v1482_v46, %v1391_v15  ;;  %v1484_v30 = vpop.f32.mrb[50].mxu1 }
 0x49d   : > { %v1485_v10 = vadd.f32 %v1484_v30, %v1392_v61  ;;  %v1486_v48 = vpop.f32.mrb[51].mxu1 }
 0x49e   : > { %v1771_v19 = vpack.c.bf16 %v1483_v3, %v1481_v24  ;;  %v1487_v33 = vadd.f32 %v1486_v48, %v1393_v5 }
 0x4a0   : > { %1623 = vst [vmem:[%s3075_s29 + $0x40] sm:$0xff] %v1771_v19  ;;  %v1772_v42 = vpack.c.bf16 %v1487_v33, %v1485_v10 }
 0x4a2   : > { %1624 = vst [vmem:[%s3075_s29 + $0x48] sm:$0xff] %v1772_v42  ;;  %v1490_v57 = vpop.f32.mrb[52].mxu1 }
 0x4a3   : > { %v1491_v1 = vadd.f32 %v1490_v57, %v1394_v13  ;;  %v1492_v2 = vpop.f32.mrb[53].mxu1 }
 0x4a4   : > { %v1493_v58 = vadd.f32 %v1492_v2, %v1395_v39  ;;  %v1494_v52 = vpop.f32.mrb[54].mxu1 }
 0x4a5   : > { %v1495_v18 = vadd.f32 %v1494_v52, %v1396_v23  ;;  %v1496_v34 = vpop.f32.mrb[55].mxu1 }
 0x4a6   : > { %v1773_v7 = vpack.c.bf16 %v1493_v58, %v1491_v1  ;;  %v1497_v51 = vadd.f32 %v1496_v34, %v1397_v55 }
 0x4a8   : > { %1625 = vst [vmem:[%s3075_s29 + $0x50] sm:$0xff] %v1773_v7  ;;  %v1774_v49 = vpack.c.bf16 %v1497_v51, %v1495_v18 }
 0x4aa   : > { %1626 = vst [vmem:[%s3075_s29 + $0x58] sm:$0xff] %v1774_v49  ;;  %v1500_v35 = vpop.f32.mrb[56].mxu1 }
 0x4ab   : > { %v1501_v38 = vadd.f32 %v1500_v35, %v1398_v63  ;;  %v1502_v53 = vpop.f32.mrb[57].mxu1 }
 0x4ac   : > { %v1503_v45 = vadd.f32 %v1502_v53, %v1399_v21  ;;  %v1504_v26 = vpop.f32.mrb[58].mxu1 }
 0x4ad   : > { %v1505_v8 = vadd.f32 %v1504_v26, %v1400_v54  ;;  %v1506_v50 = vpop.f32.mrb[59].mxu1 }
 0x4ae   : > { %v1775_v27 = vpack.c.bf16 %v1503_v45, %v1501_v38  ;;  %v1507_v60 = vadd.f32 %v1506_v50, %v1401_v11 }
 0x4b0   : > { %1627 = vst [vmem:[%s3075_s29 + $0x60] sm:$0xff] %v1775_v27  ;;  %v1776_v59 = vpack.c.bf16 %v1507_v60, %v1505_v8 }
 0x4b2   : > { %1628 = vst [vmem:[%s3075_s29 + $0x68] sm:$0xff] %v1776_v59  ;;  %v1510_v41 = vpop.f32.mrb[60].mxu1 }
 0x4b3   : > { %v1511_v22 = vadd.f32 %v1510_v41, %v1402_v43  ;;  %v1512_v9 = vpop.f32.mrb[61].mxu1 }
 0x4b4   : > { %v1513_v12 = vadd.f32 %v1512_v9, %v1403_v17  ;;  %v1514_v32 = vpop.f32.mrb[62].mxu1 }
 0x4b5   : > { %v1515_v25 = vadd.f32 %v1514_v32, %v1404_v6  ;;  %v1516_v36 = vpop.f32.mrb[63].mxu1 }
 0x4b6   : > { %v1777_v4 = vpack.c.bf16 %v1513_v12, %v1511_v22  ;;  %v1517_v40 = vadd.f32 %v1516_v36, %v1405_v14 }
 0x4b8   : > { %1629 = vst [vmem:[%s3075_s29 + $0x70] sm:$0xff] %v1777_v4  ;;  %v1778_v20 = vpack.c.bf16 %v1517_v40, %v1515_v25 }
 0x4ba   : > { %1630 = vst [vmem:[%s3075_s29 + $0x78] sm:$0xff] %v1778_v20 }
 0x4bb PF: > { %s13_s12 = sadd.s32 1, %s1975_s12  }
 0x4bc   : > { %p10_p4 = scmp.ge.s32.totalorder %s13_s12, 4  }
 0x4be   :  { %12 = sbr.rel (!%p10_p4) target bundleno = 1 (0x1), region = 62 }

</bundles_post_ra>
